<compile_context>
chip_gen: v5e
topology: v5e:2x2
jax: 0.10.0
libtpu: 0.0.40
codegen_flags: <defaults>
</compile_context>

<pallas_src>
import math

import jax
import jax.numpy as jnp
from jax.experimental import pallas as pl
from jax.experimental.pallas import tpu as pltpu


_ROW_UNIT = 16  # row granularity: covers f32 (8) and bf16 (16) sublane packing


def _round_up(x, m):
    return ((x + m - 1) // m) * m


def _choose_match_tiling(n_rows, max_per_tile):
    """Pick (matches_per_tile, padded_match_count).

    Keeps the grid count even (>=2) when there is enough work (both v7x TCs
    busy) and bounds padding waste to < grid + ROW_UNIT rows instead of
    rounding up to a full max_per_tile multiple."""
    if n_rows <= 4 * _ROW_UNIT:
        grid = 1
    else:
        grid = -(-n_rows // max_per_tile)
        grid = max(2, grid)
        if grid % 2:
            grid += 1
    per = _round_up(-(-n_rows // grid), _ROW_UNIT)
    return per, grid * per


def _resident_spec(shape, single_buffer):
    """BlockSpec for an operand that is identical for every grid step."""
    index_map = lambda *_: (0,) * len(shape)
    if single_buffer:
        return pl.BlockSpec(shape, index_map, pipeline_mode=pl.Buffered(1))
    return pl.BlockSpec(shape, index_map)


# ----------------------------------------------------------------------------
# Kernel A (small DF, e.g. toy DF=16): lane-dense block-diagonal formulation.
#   out2d = unf2d @ W_bd + cfeat @ W_c_tiled + b_tiled
# ----------------------------------------------------------------------------
def _merge_blockdiag_kernel(unf_ref, c_ref, wbd_ref, wc_ref, b_ref, out_ref):
    acc = jnp.dot(unf_ref[...], wbd_ref[...],
                  preferred_element_type=jnp.float32)
    acc = acc + jnp.dot(c_ref[...], wc_ref[...],
                        preferred_element_type=jnp.float32)
    acc = acc + b_ref[...]
    out_ref[...] = acc.astype(out_ref.dtype)


def _fine_merge_blockdiag(unf2d, cfeat, w_bd, w_c_tiled, b_tiled, *, tm,
                          out_dtype):
    M2p, DWp = unf2d.shape
    DC = cfeat.shape[1]
    grid = M2p // tm
    in_item = jnp.dtype(unf2d.dtype).itemsize
    out_item = jnp.dtype(out_dtype).itemsize
    cost = pl.CostEstimate(
        flops=2 * M2p * DWp * (DWp + DC),
        transcendentals=0,
        bytes_accessed=(M2p * (DWp + DC) * in_item
                        + (DWp * DWp + DC * DWp) * in_item + 4 * DWp
                        + M2p * DWp * out_item))

    def build(single_buffer):
        return pl.pallas_call(
            _merge_blockdiag_kernel,
            out_shape=jax.ShapeDtypeStruct((M2p, DWp), out_dtype),
            grid_spec=pltpu.PrefetchScalarGridSpec(
                num_scalar_prefetch=0,
                grid=(grid,),
                in_specs=[
                    pl.BlockSpec((tm, DWp), lambda i: (i, 0)),   # windowed fine
                    pl.BlockSpec((tm, DC), lambda i: (i, 0)),    # coarse/match
                    _resident_spec((DWp, DWp), single_buffer),   # block-diag W
                    _resident_spec((DC, DWp), single_buffer),    # fused coarse W
                    _resident_spec((1, DWp), single_buffer),     # fused bias
                ],
                out_specs=pl.BlockSpec((tm, DWp), lambda i: (i, 0)),
            ),
            compiler_params=pltpu.CompilerParams(
                dimension_semantics=("parallel",)),
            cost_estimate=cost,
        )(unf2d, cfeat, w_bd, w_c_tiled, b_tiled)

    try:
        return build(True)
    except Exception:  # pragma: no cover - Buffered(1) unsupported -> fallback
        return build(False)


# ----------------------------------------------------------------------------
# Kernel B (DF multiple of 128, production config): row formulation.
#   rows are (match, window-pos) pairs; one [rows,DF]@[DF,DF] MXU matmul, the
#   per-match coarse term is expanded over the WW rows of each match with a
#   tiny 0/1 matmul (E @ cterm) so the store stays one full lane-dense tile.
# ----------------------------------------------------------------------------
def _merge_rows_kernel(x_ref, c_ref, e_ref, wf_ref, wc_ref, b_ref, out_ref):
    acc = jnp.dot(x_ref[...], wf_ref[...],
                  preferred_element_type=jnp.float32)
    cterm = jnp.dot(c_ref[...], wc_ref[...],
                    preferred_element_type=jnp.float32)
    acc = acc + jnp.dot(e_ref[...], cterm,
                        preferred_element_type=jnp.float32)
    acc = acc + b_ref[...]
    out_ref[...] = acc.astype(out_ref.dtype)


def _fine_merge_rows(x, cfeat, e_mat, w_f, w_c, b_row, *, mpt, ww, out_dtype):
    R, DF = x.shape
    M2p, DC = cfeat.shape
    tr = mpt * ww
    grid = M2p // mpt
    in_item = jnp.dtype(x.dtype).itemsize
    out_item = jnp.dtype(out_dtype).itemsize
    cost = pl.CostEstimate(
        flops=2 * R * DF * DF + 2 * M2p * DC * DF + 2 * R * mpt * DF,
        transcendentals=0,
        bytes_accessed=(R * DF * in_item + M2p * DC * in_item
                        + (DF * DF + DC * DF) * in_item
                        + 4 * (tr * mpt + DF)
                        + R * DF * out_item))

    def build(single_buffer):
        return pl.pallas_call(
            _merge_rows_kernel,
            out_shape=jax.ShapeDtypeStruct((R, DF), out_dtype),
            grid_spec=pltpu.PrefetchScalarGridSpec(
                num_scalar_prefetch=0,
                grid=(grid,),
                in_specs=[
                    pl.BlockSpec((tr, DF), lambda i: (i, 0)),   # windowed fine
                    pl.BlockSpec((mpt, DC), lambda i: (i, 0)),  # coarse/match
                    _resident_spec((tr, mpt), single_buffer),   # expand matrix
                    _resident_spec((DF, DF), single_buffer),    # fine weight
                    _resident_spec((DC, DF), single_buffer),    # fused coarse W
                    _resident_spec((1, DF), single_buffer),     # fused bias
                ],
                out_specs=pl.BlockSpec((tr, DF), lambda i: (i, 0)),
            ),
            compiler_params=pltpu.CompilerParams(
                dimension_semantics=("parallel",)),
            cost_estimate=cost,
        )(x, cfeat, e_mat, w_f, w_c, b_row)

    try:
        return build(True)
    except Exception:  # pragma: no cover - Buffered(1) unsupported -> fallback
        return build(False)


# ----------------------------------------------------------------------------
# Forward wrapper (matches FinePreprocess.forward semantics)
# ----------------------------------------------------------------------------
def fine_preprocess(params, feat_f0, feat_f1, feat_c0, feat_c1, data, *,
                    W, d_model_f, cat_c_feat=True, compute_dtype=None,
                    tm_max=512, mpt_max=64):
    stride = data['hw0_f'][0] // data['hw0_c'][0]
    b_ids, i_ids, j_ids = data['b_ids'], data['i_ids'], data['j_ids']
    M = int(b_ids.shape[0])
    WW = W * W
    DF = d_model_f
    out_dtype = feat_f0.dtype
    if M == 0:
        z = jnp.empty((0, WW, DF), dtype=out_dtype)
        return z, z

    N, C, H, Wd = feat_f0.shape
    assert C == DF
    p = W // 2
    Hp, Wp = H + 2 * p, Wd + 2 * p
    Wc_u = (Wd + 2 * p - W) // stride + 1   # unfold grid width (== hw0_c[1])

    # NHWC + spatial zero-pad + (optional) compute-dtype cast of the *raw*
    # fine maps only; the full-map unfold blow-up no longer exists.
    feat_f = jnp.concatenate([feat_f0, feat_f1], axis=0)          # [2N,C,H,Wd]
    feat_f = jnp.transpose(feat_f, (0, 2, 3, 1))                  # NHWC
    if compute_dtype is not None:
        feat_f = feat_f.astype(compute_dtype)
    padded = jnp.pad(feat_f, ((0, 0), (p, p), (p, p), (0, 0)))
    flat = padded.reshape(2 * N * Hp * Wp, DF)                    # gather source

    use_row_path = cat_c_feat and (DF % 128 == 0)
    if cat_c_feat and not use_row_path:
        # Lane-dense block-diag path: pad WW -> WWp in *index space* (duplicate
        # window positions, outputs sliced off) -> no jnp.pad copy needed.
        step = 128 // math.gcd(DF, 128)
        WWk = _round_up(WW, step)
        kk = jnp.minimum(jnp.arange(WWk), WW - 1)
    else:
        WWk = WW
        kk = jnp.arange(WW)
    kh = kk // W
    kw = kk % W

    M2 = 2 * M
    mpt, M2p = _choose_match_tiling(M2, mpt_max if use_row_path else tm_max)
    pad_m = M2p - M2

    # Pad only the cheap index vectors (never the big tensors).
    b_all = jnp.concatenate([b_ids, b_ids + N])
    pos_all = jnp.concatenate([i_ids, j_ids])
    if pad_m:
        b_all = jnp.pad(b_all, (0, pad_m))
        pos_all = jnp.pad(pos_all, (0, pad_m))

    # Flat single-axis row gather of exactly the matched windows.
    h0 = (pos_all // Wc_u) * stride
    w0 = (pos_all % Wc_u) * stride
    rows = (b_all[:, None] * (Hp * Wp)
            + (h0[:, None] + kh[None, :]) * Wp
            + (w0[:, None] + kw[None, :]))                        # [M2p, WWk]
    gathered = flat[rows.reshape(-1)]                             # [M2p*WWk, DF]

    if not cat_c_feat:
        out = gathered.reshape(M2p, WWk, DF)[:M2].astype(out_dtype)
        return out[:M], out[M:]

    # Per-match coarse features (small arrays; concat/pad is cheap).
    c_all = jnp.concatenate([feat_c0[b_ids, i_ids],
                             feat_c1[b_ids, j_ids]], axis=0)      # [M2, DC]
    if pad_m:
        c_all = jnp.pad(c_all, ((0, pad_m), (0, 0)))
    DC = c_all.shape[1]

    # Fold down_proj into merge_feat's coarse half once per call.
    w_down, b_down = params['w_down'], params['b_down']
    w_merge, b_merge = params['w_merge'], params['b_merge']
    w_merge_f = w_merge[:DF, :]                                   # fine half
    w_merge_c = w_merge[DF:, :]                                   # coarse half
    w_c_fused = w_down @ w_merge_c                                # (DC, DF)
    b_fused = (b_down @ w_merge_c + b_merge).astype(jnp.float32)  # (DF,)

    cdt = compute_dtype if compute_dtype is not None else gathered.dtype
    c_all = c_all.astype(cdt)

    if use_row_path:
        tr = mpt * WW
        e_mat = (jnp.arange(tr)[:, None] // WW
                 == jnp.arange(mpt)[None, :]).astype(jnp.float32)  # [tr, mpt]
        out_rows = _fine_merge_rows(
            gathered, c_all, e_mat,
            w_merge_f.astype(cdt), w_c_fused.astype(cdt), b_fused[None, :],
            mpt=mpt, ww=WW, out_dtype=out_dtype)
        out = out_rows.reshape(M2p, WW, DF)[:M2]
    else:
        DWp = WWk * DF
        unf2d = gathered.reshape(M2p, DWp)                        # free view
        w_bd = jnp.kron(jnp.eye(WWk, dtype=w_merge_f.dtype), w_merge_f)
        w_c_tiled = jnp.tile(w_c_fused, (1, WWk))
        b_tiled = jnp.tile(b_fused, WWk).reshape(1, DWp)
        out2d = _fine_merge_blockdiag(
            unf2d, c_all, w_bd.astype(cdt), w_c_tiled.astype(cdt), b_tiled,
            tm=mpt, out_dtype=out_dtype)
        out = out2d.reshape(M2p, WWk, DF)[:M2, :WW, :]

    return out[:M], out[M:]


# ----------------------------------------------------------------------------
# Pure-JAX reference (explicit unfold + unfused weights) for verification.
# ----------------------------------------------------------------------------
def unfold_windows(feat_f, W, stride):
    # feat_f: [N, C, H, Wd] (NCHW)
    N, C, H, Wd = feat_f.shape
    p = W // 2
    padded = jnp.pad(feat_f, ((0, 0), (0, 0), (p, p), (p, p)))
    Hc = (H + 2 * p - W) // stride + 1
    Wc = (Wd + 2 * p - W) // stride + 1
    idx_h = (jnp.arange(Hc) * stride)[:, None] + jnp.arange(W)[None, :]
    idx_w = (jnp.arange(Wc) * stride)[:, None] + jnp.arange(W)[None, :]
    win = padded[:, :, idx_h[:, :, None, None], idx_w[None, None, :, :]]
    win = win.transpose(0, 2, 4, 3, 5, 1).reshape(N, Hc * Wc, W * W, C)
    return win


def fine_preprocess_ref(params, feat_f0, feat_f1, feat_c0, feat_c1, data,
                        *, W, d_model_f):
    stride = data['hw0_f'][0] // data['hw0_c'][0]
    b_ids, i_ids, j_ids = data['b_ids'], data['i_ids'], data['j_ids']
    win0 = unfold_windows(feat_f0, W, stride)
    win1 = unfold_windows(feat_f1, W, stride)
    f0 = win0[b_ids, i_ids]
    f1 = win1[b_ids, j_ids]
    c0 = feat_c0[b_ids, i_ids]
    c1 = feat_c1[b_ids, j_ids]
    feat_c_win = jnp.concatenate([c0, c1], 0) @ params['w_down'] + params['b_down']
    feat_unf = jnp.concatenate([f0, f1], 0)
    WW = W * W
    rep = jnp.broadcast_to(feat_c_win[:, None, :],
                           (feat_c_win.shape[0], WW, d_model_f))
    cat = jnp.concatenate([feat_unf, rep], -1)
    out = cat @ params['w_merge'] + params['b_merge']
    M = b_ids.shape[0]
    return out[:M], out[M:]


if __name__ == "__main__":
    def make_inputs(key, N, DC, DF, W, Hc, Wc, Hf, Wf, M):
        keys = jax.random.split(key, 9)
        feat_f0 = jax.random.normal(keys[0], (N, DF, Hf, Wf), jnp.float32)
        feat_f1 = jax.random.normal(keys[1], (N, DF, Hf, Wf), jnp.float32)
        feat_c0 = jax.random.normal(keys[2], (N, Hc * Wc, DC), jnp.float32)
        feat_c1 = jax.random.normal(keys[3], (N, Hc * Wc, DC), jnp.float32)
        b_ids = jax.random.randint(keys[4], (M,), 0, N)
        i_ids = jax.random.randint(keys[5], (M,), 0, Hc * Wc)
        j_ids = jax.random.randint(keys[6], (M,), 0, Hc * Wc)
        params = {
            'w_down': jax.random.normal(keys[7], (DC, DF), jnp.float32)
                      * jnp.sqrt(2.0 / DF),
            'b_down': jnp.zeros((DF,), jnp.float32),
            'w_merge': jax.random.normal(keys[8], (2 * DF, DF), jnp.float32)
                       * jnp.sqrt(2.0 / DF),
            'b_merge': jnp.zeros((DF,), jnp.float32),
        }
        data = {'hw0_f': (Hf, Wf), 'hw0_c': (Hc, Wc),
                'b_ids': b_ids, 'i_ids': i_ids, 'j_ids': j_ids}
        return params, feat_f0, feat_f1, feat_c0, feat_c1, data

    k1, k2 = jax.random.split(jax.random.PRNGKey(0))

    # --- config A: toy (DF=16) -> lane-dense block-diagonal kernel path -----
    N, DC, DF, W, M = 2, 32, 16, 5, 6
    Hc = Wc = 8
    Hf = Wf = 16
    argsA = make_inputs(k1, N, DC, DF, W, Hc, Wc, Hf, Wf, M)
    f0, f1 = fine_preprocess(*argsA, W=W, d_model_f=DF)
    jax.block_until_ready((f0, f1))
    r0, r1 = fine_preprocess_ref(*argsA, W=W, d_model_f=DF)
    assert f0.shape == (M, W * W, DF) and f1.shape == (M, W * W, DF)
    assert jnp.allclose(f0, r0, atol=1e-3, rtol=1e-3)
    assert jnp.allclose(f1, r1, atol=1e-3, rtol=1e-3)
    # bf16 traffic mode (recommended on v5e/v6e/v7x); checked against the f32
    # Pallas output (tighter than checking against the reference).
    g0, g1 = fine_preprocess(*argsA, W=W, d_model_f=DF,
                             compute_dtype=jnp.bfloat16)
    jax.block_until_ready((g0, g1))
    assert jnp.allclose(g0, f0, atol=0.1, rtol=0.1)
    assert jnp.allclose(g1, f1, atol=0.1, rtol=0.1)

    # --- config B: production channel count (DF=128) -> row-layout kernel ---
    N, DC, DF, W, M = 2, 256, 128, 5, 6
    Hc = Wc = 8
    Hf = Wf = 16
    argsB = make_inputs(k2, N, DC, DF, W, Hc, Wc, Hf, Wf, M)
    f0, f1 = fine_preprocess(*argsB, W=W, d_model_f=DF)
    jax.block_until_ready((f0, f1))
    r0, r1 = fine_preprocess_ref(*argsB, W=W, d_model_f=DF)
    assert f0.shape == (M, W * W, DF) and f1.shape == (M, W * W, DF)
    assert jnp.allclose(f0, r0, atol=1e-3, rtol=1e-3)
    assert jnp.allclose(f1, r1, atol=1e-3, rtol=1e-3)
    g0, g1 = fine_preprocess(*argsB, W=W, d_model_f=DF,
                             compute_dtype=jnp.bfloat16)
    jax.block_until_ready((g0, g1))
    assert jnp.allclose(g0, f0, atol=0.1, rtol=0.1)
    assert jnp.allclose(g1, f1, atol=0.1, rtol=0.1)

    print("KERNEL_OK")
</pallas_src>

<mosaic_0001>
module attributes {stable_mosaic.version = 11 : i64} {
  func.func @_merge_blockdiag_kernel(%arg0: i32, %arg1: memref<16x512xf32, #tpu.memory_space<vmem>>, %arg2: memref<16x32xf32, #tpu.memory_space<vmem>>, %arg3: memref<512x512xf32, #tpu.memory_space<vmem>>, %arg4: memref<32x512xf32, #tpu.memory_space<vmem>>, %arg5: memref<1x512xf32, #tpu.memory_space<vmem>>, %arg6: memref<16x512xf32, #tpu.memory_space<vmem>>) attributes {dimension_semantics = [#tpu.dimension_semantics<parallel>], iteration_bounds = array<i64: 1>, scalar_prefetch = 0 : i64, scratch_operands = 0 : i64, tpu.core_type = #tpu.core_type<tc>, window_params = [{transform_indices = @transform_0, window_bounds = array<i64: 16, 512>}, {transform_indices = @transform_1, window_bounds = array<i64: 16, 32>}, {pipeline_mode = #tpu.pipeline_mode<synchronous>, transform_indices = @transform_2, window_bounds = array<i64: 512, 512>}, {pipeline_mode = #tpu.pipeline_mode<synchronous>, transform_indices = @transform_3, window_bounds = array<i64: 32, 512>}, {pipeline_mode = #tpu.pipeline_mode<synchronous>, transform_indices = @transform_4, window_bounds = array<i64: 1, 512>}, {transform_indices = @transform_5, window_bounds = array<i64: 16, 512>}]} {
    %c0 = arith.constant 0 : index
    %c0_0 = arith.constant 0 : index
    %0 = vector.load %arg1[%c0, %c0_0] : memref<16x512xf32, #tpu.memory_space<vmem>>, vector<16x512xf32>
    %c0_1 = arith.constant 0 : index
    %c0_2 = arith.constant 0 : index
    %1 = vector.load %arg3[%c0_1, %c0_2] : memref<512x512xf32, #tpu.memory_space<vmem>>, vector<512x512xf32>
    %cst = arith.constant dense<0.000000e+00> : vector<16x512xf32>
    %2 = tpu.matmul %0, %1, %cst {dimension_numbers = #tpu.dot_dimension_numbers<[1], [0], [0], [1], [0, 0, 1, 1], [], []>} : vector<16x512xf32>, vector<512x512xf32>, vector<16x512xf32> -> vector<16x512xf32>
    %c0_3 = arith.constant 0 : index
    %c0_4 = arith.constant 0 : index
    %3 = vector.load %arg2[%c0_3, %c0_4] : memref<16x32xf32, #tpu.memory_space<vmem>>, vector<16x32xf32>
    %c0_5 = arith.constant 0 : index
    %c0_6 = arith.constant 0 : index
    %4 = vector.load %arg4[%c0_5, %c0_6] : memref<32x512xf32, #tpu.memory_space<vmem>>, vector<32x512xf32>
    %cst_7 = arith.constant dense<0.000000e+00> : vector<16x512xf32>
    %5 = tpu.matmul %3, %4, %cst_7 {dimension_numbers = #tpu.dot_dimension_numbers<[1], [0], [0], [1], [0, 0, 1, 1], [], []>} : vector<16x32xf32>, vector<32x512xf32>, vector<16x512xf32> -> vector<16x512xf32>
    %6 = arith.addf %2, %5 : vector<16x512xf32>
    %c0_8 = arith.constant 0 : index
    %c0_9 = arith.constant 0 : index
    %7 = vector.load %arg5[%c0_8, %c0_9] : memref<1x512xf32, #tpu.memory_space<vmem>>, vector<1x512xf32>
    %8 = vector.broadcast %7 : vector<1x512xf32> to vector<16x512xf32>
    %9 = arith.addf %6, %8 : vector<16x512xf32>
    %c0_10 = arith.constant 0 : index
    %c0_11 = arith.constant 0 : index
    %10 = vector.load %arg6[%c0_10, %c0_11] : memref<16x512xf32, #tpu.memory_space<vmem>>, vector<16x512xf32>
    tpu.vector_store %arg6[%c0_10, %c0_11], %9 {strides = array<i32>} : memref<16x512xf32, #tpu.memory_space<vmem>>, vector<16x512xf32>,
    return
  }
  func.func @transform_0(%arg0: i32) -> (i32, i32) {
    %c0_i32 = arith.constant 0 : i32
    %c0_i32_0 = arith.constant 0 : i32
    return %arg0, %c0_i32 : i32, i32
  }
  func.func @transform_1(%arg0: i32) -> (i32, i32) {
    %c0_i32 = arith.constant 0 : i32
    %c0_i32_0 = arith.constant 0 : i32
    return %arg0, %c0_i32 : i32, i32
  }
  func.func @transform_2(%arg0: i32) -> (i32, i32) {
    %c0_i32 = arith.constant 0 : i32
    %c0_i32_0 = arith.constant 0 : i32
    %c0_i32_1 = arith.constant 0 : i32
    return %c0_i32, %c0_i32_0 : i32, i32
  }
  func.func @transform_3(%arg0: i32) -> (i32, i32) {
    %c0_i32 = arith.constant 0 : i32
    %c0_i32_0 = arith.constant 0 : i32
    %c0_i32_1 = arith.constant 0 : i32
    return %c0_i32, %c0_i32_0 : i32, i32
  }
  func.func @transform_4(%arg0: i32) -> (i32, i32) {
    %c0_i32 = arith.constant 0 : i32
    %c0_i32_0 = arith.constant 0 : i32
    %c0_i32_1 = arith.constant 0 : i32
    return %c0_i32, %c0_i32_0 : i32, i32
  }
  func.func @transform_5(%arg0: i32) -> (i32, i32) {
    %c0_i32 = arith.constant 0 : i32
    %c0_i32_0 = arith.constant 0 : i32
    return %arg0, %c0_i32 : i32, i32
  }
}

module attributes {stable_mosaic.version = 11 : i64} {
  func.func @_merge_blockdiag_kernel(%arg0: i32, %arg1: memref<16x512xf32, #tpu.memory_space<vmem>>, %arg2: memref<16x32xf32, #tpu.memory_space<vmem>>, %arg3: memref<512x512xf32, #tpu.memory_space<vmem>>, %arg4: memref<32x512xf32, #tpu.memory_space<vmem>>, %arg5: memref<1x512xf32, #tpu.memory_space<vmem>>, %arg6: memref<16x512xf32, #tpu.memory_space<vmem>>) attributes {dimension_semantics = [#tpu.dimension_semantics<parallel>], iteration_bounds = array<i64: 1>, scalar_prefetch = 0 : i64, scratch_operands = 0 : i64, tpu.core_type = #tpu.core_type<tc>, window_params = [{transform_indices = @transform_0, window_bounds = array<i64: 16, 512>}, {transform_indices = @transform_1, window_bounds = array<i64: 16, 32>}, {pipeline_mode = #tpu.pipeline_mode<synchronous>, transform_indices = @transform_2, window_bounds = array<i64: 512, 512>}, {pipeline_mode = #tpu.pipeline_mode<synchronous>, transform_indices = @transform_3, window_bounds = array<i64: 32, 512>}, {pipeline_mode = #tpu.pipeline_mode<synchronous>, transform_indices = @transform_4, window_bounds = array<i64: 1, 512>}, {transform_indices = @transform_5, window_bounds = array<i64: 16, 512>}]} {
    %c0 = arith.constant 0 : index
    %c0_0 = arith.constant 0 : index
    %0 = vector.load %arg1[%c0, %c0_0] : memref<16x512xf32, #tpu.memory_space<vmem>>, vector<16x512xf32>
    %c0_1 = arith.constant 0 : index
    %c0_2 = arith.constant 0 : index
    %1 = vector.load %arg3[%c0_1, %c0_2] : memref<512x512xf32, #tpu.memory_space<vmem>>, vector<512x512xf32>
    %cst = arith.constant dense<0.000000e+00> : vector<16x512xf32>
    %2 = tpu.matmul %0, %1, %cst {dimension_numbers = #tpu.dot_dimension_numbers<[1], [0], [0], [1], [0, 0, 1, 1], [], []>} : vector<16x512xf32>, vector<512x512xf32>, vector<16x512xf32> -> vector<16x512xf32>
    %c0_3 = arith.constant 0 : index
    %c0_4 = arith.constant 0 : index
    %3 = vector.load %arg2[%c0_3, %c0_4] : memref<16x32xf32, #tpu.memory_space<vmem>>, vector<16x32xf32>
    %c0_5 = arith.constant 0 : index
    %c0_6 = arith.constant 0 : index
    %4 = vector.load %arg4[%c0_5, %c0_6] : memref<32x512xf32, #tpu.memory_space<vmem>>, vector<32x512xf32>
    %cst_7 = arith.constant dense<0.000000e+00> : vector<16x512xf32>
    %5 = tpu.matmul %3, %4, %cst_7 {dimension_numbers = #tpu.dot_dimension_numbers<[1], [0], [0], [1], [0, 0, 1, 1], [], []>} : vector<16x32xf32>, vector<32x512xf32>, vector<16x512xf32> -> vector<16x512xf32>
    %6 = arith.addf %2, %5 : vector<16x512xf32>
    %c0_8 = arith.constant 0 : index
    %c0_9 = arith.constant 0 : index
    %7 = vector.load %arg5[%c0_8, %c0_9] : memref<1x512xf32, #tpu.memory_space<vmem>>, vector<1x512xf32>
    %8 = vector.broadcast %7 : vector<1x512xf32> to vector<16x512xf32>
    %9 = arith.addf %6, %8 : vector<16x512xf32>
    %c0_10 = arith.constant 0 : index
    %c0_11 = arith.constant 0 : index
    %10 = vector.load %arg6[%c0_10, %c0_11] : memref<16x512xf32, #tpu.memory_space<vmem>>, vector<16x512xf32>
    tpu.vector_store %arg6[%c0_10, %c0_11], %9 {strides = array<i32>} : memref<16x512xf32, #tpu.memory_space<vmem>>, vector<16x512xf32>,
    return
  }
  func.func @transform_0(%arg0: i32) -> (i32, i32) {
    %c0_i32 = arith.constant 0 : i32
    %c0_i32_0 = arith.constant 0 : i32
    return %arg0, %c0_i32 : i32, i32
  }
  func.func @transform_1(%arg0: i32) -> (i32, i32) {
    %c0_i32 = arith.constant 0 : i32
    %c0_i32_0 = arith.constant 0 : i32
    return %arg0, %c0_i32 : i32, i32
  }
  func.func @transform_2(%arg0: i32) -> (i32, i32) {
    %c0_i32 = arith.constant 0 : i32
    %c0_i32_0 = arith.constant 0 : i32
    %c0_i32_1 = arith.constant 0 : i32
    return %c0_i32, %c0_i32_0 : i32, i32
  }
  func.func @transform_3(%arg0: i32) -> (i32, i32) {
    %c0_i32 = arith.constant 0 : i32
    %c0_i32_0 = arith.constant 0 : i32
    %c0_i32_1 = arith.constant 0 : i32
    return %c0_i32, %c0_i32_0 : i32, i32
  }
  func.func @transform_4(%arg0: i32) -> (i32, i32) {
    %c0_i32 = arith.constant 0 : i32
    %c0_i32_0 = arith.constant 0 : i32
    %c0_i32_1 = arith.constant 0 : i32
    return %c0_i32, %c0_i32_0 : i32, i32
  }
  func.func @transform_5(%arg0: i32) -> (i32, i32) {
    %c0_i32 = arith.constant 0 : i32
    %c0_i32_0 = arith.constant 0 : i32
    return %arg0, %c0_i32 : i32, i32
  }
}

</mosaic_0001>

<bundles_post_ra>
// kernel: tpu_custom_call.1
= control target key start
LH: loop header
LB: loop body
LE: loop exit
PB: predicated region body
PF: predicated region fallthrough
CT: control target
= control target key end

     0   :  { %10 = vsyncpa [#allocation3], 0  ;;  %s1201_s0 = inlined_call_operand.hbm [shape: f32[16,512], index: 0, kind: input, shape index: {}]   ;;  %s1202_s1 = inlined_call_operand.hbm [shape: f32[16,32], index: 1, kind: input, shape index: {}]   ;;  %s1203_s2 = inlined_call_operand.hbm [shape: f32[512,512], index: 2, kind: input, shape index: {}]   ;;  %s1204_s3 = inlined_call_operand.hbm [shape: f32[32,512], index: 3, kind: input, shape index: {}]   ;;  %s1205_s4 = inlined_call_operand.hbm [shape: f32[1,512], index: 4, kind: input, shape index: {}]   ;;  %s1206_s5 = inlined_call_operand.hbm [shape: f32[16,512], index: 5, kind: output, shape index: {}]  }
   0x1   :  { %11 = vsyncpa [#allocation6], 0 }
   0x2   :  { %12 = vsyncpa [#allocation9], 0  ;;  %s31_s20 = sshll.u32 %s1202_s1, 4  ;;  %s32_s20 = int_to_ptr.hbm [resolvable:$true] %s31_s20 }
   0x3   :  { %13 = vsyncpa [#allocation4], 0  ;;  %s1063_s21 = smov [#allocation5]   ;;  %s1064_s23 = smov 128  }
   0x4   :  { %s33_s22 = sshll.u32 %s1063_s21, 4  ;;  %s1065_s24 = smov 8   ;;  %s34_s22 = int_to_ptr.vmem [resolvable:$true] %s33_s22 }
   0x5   :  { %39 = dma.hbm_to_vmem [thread:$0]  %s32_s20, 256, %s34_s22, [#allocation6], %s1064_s23, %s1064_s23, %s1065_s24  }
   0x6   :  { %s57_s27 = sshll.u32 %s1204_s3, 4  ;;  %s1066_s28 = smov [#allocation8]   ;;  %s58_s27 = int_to_ptr.hbm [resolvable:$true] %s57_s27 }
   0x7   :  { %s59_s29 = sshll.u32 %s1066_s28, 4  ;;  %s18_s7 = sshll.u32 %s1201_s0, 4  ;;  %s60_s29 = int_to_ptr.vmem [resolvable:$true] %s59_s29  ;;  %s19_s7 = int_to_ptr.hbm [resolvable:$true] %s18_s7 }
   0x8   :  { %s1067_s1 = smov 512   ;;  %s1068_s8 = smov 32  }
   0x9   :  { %65 = dma.hbm_to_vmem [thread:$0]  %s58_s27, 2048, %s60_s29, [#allocation9], %s1067_s1, %s1067_s1, %s1068_s8  }
   0xa   :  { %s44_s11 = sshll.u32 %s1203_s2, 4  ;;  %s1069_s3 = smov [#allocation2]   ;;  %s45_s11 = int_to_ptr.hbm [resolvable:$true] %s44_s11 }
   0xb   :  { %s20_s12 = sshll.u32 %s1069_s3, 4  ;;  %s1070_s0 = smov [#allocation7]   ;;  %s21_s12 = int_to_ptr.vmem [resolvable:$true] %s20_s12 }
   0xc   :  { %26 = dma.hbm_to_vmem [thread:$0]  %s19_s7, 1024, %s21_s12, [#allocation3], %s1067_s1, %s1067_s1, %s1068_s8  }
   0xd   :  { %s46_s13 = sshll.u32 %s1070_s0, 4  ;;  %s71_s16 = sshll.u32 %s1205_s4, 4  ;;  %s47_s13 = int_to_ptr.vmem [resolvable:$true] %s46_s13  ;;  %s72_s16 = int_to_ptr.hbm [resolvable:$true] %s71_s16 }
   0xe   :  { %52 = dma.hbm_to_vmem [thread:$0]  %s45_s11, 32768, %s47_s13, [#allocation6], %s1067_s1, %s1067_s1, %s1068_s8  }
   0xf   :  { %s1071_s2 = smov [#allocation10]  }
  0x10   :  { %s73_s17 = sshll.u32 %s1071_s2, 4  ;;  %s74_s17 = int_to_ptr.vmem [resolvable:$true] %s73_s17 }
  0x11   :  { %76 = dma.hbm_to_vmem [thread:$0]  %s72_s16, 64, %s74_s17, [#allocation9]  }
  0x12   :  { %1055 = dma.done.wait [#allocation3], 1024  }
  0x13   :  { %1056 = vsyncadd [#allocation3], 4294966272 }
  0x14   :  { %1057 = dma.done.wait [#allocation6], 33024  }
  0x15   :  { %1058 = vsyncadd [#allocation6], 4294934272 }
  0x16   :  { %1059 = dma.done.wait [#allocation9], 2112  }
  0x17   :  { %1060 = vsyncadd [#allocation9], 4294965184  ;;  %v375_v0 = vld [vmem:[#allocation8 + $0x60] sm:$0xff]  ;;  %v377_v1 = vld [vmem:[#allocation8 + $0x70] sm:$0xff]  ;;  %vm379_vm0 = vcmask 261120   ;;  %s1072_s4 = smov [#allocation11]  }
  0x18   :  { %v371_v2 = vld [vmem:[#allocation8 + $0x40] sm:$0xff]  ;;  %398 = vmatpush.msra.mxu0 %v375_v0  ;;  %444 = vmatpush.msra.mxu2 %v377_v1  ;;  %v376_v3 = vld [vmem:[#allocation8 + $0x68] sm:$0xff]  ;;  %v373_v4 = vld [vmem:[#allocation8 + $0x50] sm:$0xff]  ;;  %s876_s18 = sshll.u32 %s1072_s4, 4  ;;  %s878_s21 = sshll.u32 %s1206_s5, 4  ;;  %s877_s18 = int_to_ptr.vmem [resolvable:$true] %s876_s18  ;;  %s879_s21 = int_to_ptr.hbm [resolvable:$true] %s878_s21 }
  0x19   :  { %v378_v5 = vld [vmem:[#allocation8 + $0x78] sm:$0xff]  ;;  %421 = vmatpush.msra.mxu1 %v376_v3  ;;  %v367_v6 = vld [vmem:[#allocation8 + $0x20] sm:$0xff]  ;;  %v372_v7 = vld [vmem:[#allocation8 + $0x48] sm:$0xff] }
  0x1a   :  { %467 = vmatpush.msra.mxu3 %v378_v5  ;;  %v369_v8 = vld [vmem:[#allocation8 + $0x30] sm:$0xff]  ;;  %399 = vmatpush.msra.mxu0 %v371_v2  ;;  %v374_v9 = vld [vmem:[#allocation8 + $0x58] sm:$0xff]  ;;  %v368_v10 = vld [vmem:[#allocation8 + $0x28] sm:$0xff] }
  0x1b   :  { %445 = vmatpush.msra.mxu2 %v373_v4  ;;  %422 = vmatpush.msra.mxu1 %v372_v7  ;;  %v363_v11 = vld [vmem:[#allocation8] sm:$0xff]  ;;  %v365_v12 = vld [vmem:[#allocation8 + $0x10] sm:$0xff]  ;;  %v370_v13 = vld [vmem:[#allocation8 + $0x38] sm:$0xff] }
  0x1c   :  { %468 = vmatpush.msra.mxu3 %v374_v9  ;;  %400 = vmatpush.msra.mxu0 %v367_v6  ;;  %v165_v14 = vld [vmem:[#allocation7 + $0x1e0] sm:$0xff]  ;;  %v364_v16 = vld [vmem:[#allocation8 + $0x8] sm:$0xff]  ;;  %v366_v17 = vld [vmem:[#allocation8 + $0x18] sm:$0xff] }
  0x1d   :  { %446 = vmatpush.msra.mxu2 %v369_v8  ;;  %v293_v15 = vld [vmem:[#allocation7 + $0x5e0] sm:$0xff]  ;;  %423 = vmatpush.msra.mxu1 %v368_v10  ;;  %v361_v46 = vld [vmem:[#allocation5] sm:$0xff]  ;;  %v362_v63 = vld [vmem:[#allocation5 + $0x8] sm:$0xff] }
  0x1e   :  { %469 = vmatpush.msra.mxu3 %v370_v13  ;;  %401 = vmatpush.msra.mxu0 %v363_v11  ;;  %v161_v18 = vld [vmem:[#allocation7 + $0x1c0] sm:$0xff] }
  0x1f   :  { %447 = vmatpush.msra.mxu2 %v365_v12  ;;  %v229_v19 = vld [vmem:[#allocation7 + $0x3e0] sm:$0xff]  ;;  %424 = vmatpush.msra.mxu1 %v364_v16 }
  0x20   :  { %478 = vmatpush.msrb.mxu0 %v165_v14  ;;  %v289_v20 = vld [vmem:[#allocation7 + $0x5c0] sm:$0xff]  ;;  %470 = vmatpush.msra.mxu3 %v366_v17  ;;  %v166_v17 = vld [vmem:[#allocation7 + $0x1e8] sm:$0xff] }
  0x21   :  { %524 = vmatpush.msrb.mxu2 %v293_v15  ;;  %v357_v21 = vld [vmem:[#allocation7 + $0x7e0] sm:$0xff]  ;;  %501 = vmatpush.msrb.mxu1 %v229_v19 }
  0x22   :  { %v157_v22 = vld [vmem:[#allocation7 + $0x1a0] sm:$0xff]  ;;  %479 = vmatpush.msrb.mxu0 %v161_v18  ;;  %547 = vmatpush.msrb.mxu3 %v357_v21  ;;  %v294_v18 = vld [vmem:[#allocation7 + $0x5e8] sm:$0xff]  ;;  %v1137_v21 = vld [vmem:[#allocation2] sm:$0xff] }
  0x23   :  { %v225_v23 = vld [vmem:[#allocation7 + $0x3c0] sm:$0xff]  ;;  %525 = vmatpush.msrb.mxu2 %v289_v20  ;;  %893 = vmatmul.msk.f32.vlgmr.msra.gmra.mxu0 %vm379_vm0, %v361_v46 }
  0x24   :  { %v285_v24 = vld [vmem:[#allocation7 + $0x5a0] sm:$0xff]  ;;  %480 = vmatpush.msrb.mxu0 %v157_v22  ;;  %502 = vmatpush.msrb.mxu1 %v225_v23  ;;  %v1140_v22 = vld [vmem:[#allocation2 + $0x18] sm:$0xff] }
  0x25   :  { %v353_v25 = vld [vmem:[#allocation7 + $0x7c0] sm:$0xff]  ;;  %526 = vmatpush.msrb.mxu2 %v285_v24  ;;  %899 = vmatmul.msk.f32.vlgmr.msra.gmra.mxu3 %vm379_vm0, %v361_v46  ;;  %v162_v23 = vld [vmem:[#allocation7 + $0x1c8] sm:$0xff] }
  0x26   :  { %v153_v26 = vld [vmem:[#allocation7 + $0x180] sm:$0xff]  ;;  %548 = vmatpush.msrb.mxu3 %v353_v25  ;;  %897 = vmatmul.msk.f32.vlgmr.msra.gmra.mxu2 %vm379_vm0, %v361_v46  ;;  %v230_v24 = vld [vmem:[#allocation7 + $0x3e8] sm:$0xff] }
  0x27   :  { %v221_v27 = vld [vmem:[#allocation7 + $0x3a0] sm:$0xff]  ;;  %481 = vmatpush.msrb.mxu0 %v153_v26  ;;  %895 = vmatmul.msk.f32.vlgmr.msra.gmra.mxu1 %vm379_vm0, %v361_v46  ;;  %v290_v25 = vld [vmem:[#allocation7 + $0x5c8] sm:$0xff] }
  0x28   :  { %v281_v28 = vld [vmem:[#allocation7 + $0x580] sm:$0xff]  ;;  %503 = vmatpush.msrb.mxu1 %v221_v27  ;;  %v358_v26 = vld [vmem:[#allocation7 + $0x7e8] sm:$0xff]  ;;  %v1143_v27 = vld [vmem:[#allocation2 + $0x8] sm:$0xff] }
  0x29   :  { %v349_v29 = vld [vmem:[#allocation7 + $0x7a0] sm:$0xff]  ;;  %527 = vmatpush.msrb.mxu2 %v281_v28  ;;  %v158_v28 = vld [vmem:[#allocation7 + $0x1a8] sm:$0xff] }
  0x2a   :  { %v149_v30 = vld [vmem:[#allocation7 + $0x160] sm:$0xff]  ;;  %549 = vmatpush.msrb.mxu3 %v349_v29  ;;  %v226_v29 = vld [vmem:[#allocation7 + $0x3c8] sm:$0xff] }
  0x2b   :  { %v217_v31 = vld [vmem:[#allocation7 + $0x380] sm:$0xff]  ;;  %482 = vmatpush.msrb.mxu0 %v149_v30  ;;  %v286_v30 = vld [vmem:[#allocation7 + $0x5a8] sm:$0xff] }
  0x2c   :  { %v277_v32 = vld [vmem:[#allocation7 + $0x560] sm:$0xff]  ;;  %504 = vmatpush.msrb.mxu1 %v217_v31  ;;  %894 = vmatmul.msk.f32.gmra.mxu0 %vm379_vm0, %v362_v63  ;;  %v354_v31 = vld [vmem:[#allocation7 + $0x7c8] sm:$0xff] }
  0x2d   :  { %v345_v33 = vld [vmem:[#allocation7 + $0x780] sm:$0xff]  ;;  %528 = vmatpush.msrb.mxu2 %v277_v32  ;;  %900 = vmatmul.msk.f32.gmra.mxu3 %vm379_vm0, %v362_v63  ;;  %v154_v32 = vld [vmem:[#allocation7 + $0x188] sm:$0xff] }
  0x2e   :  { %v145_v34 = vld [vmem:[#allocation7 + $0x140] sm:$0xff]  ;;  %550 = vmatpush.msrb.mxu3 %v345_v33  ;;  %898 = vmatmul.msk.f32.gmra.mxu2 %vm379_vm0, %v362_v63  ;;  %v222_v33 = vld [vmem:[#allocation7 + $0x3a8] sm:$0xff] }
  0x2f   :  { %v213_v35 = vld [vmem:[#allocation7 + $0x360] sm:$0xff]  ;;  %483 = vmatpush.msrb.mxu0 %v145_v34  ;;  %896 = vmatmul.msk.f32.gmra.mxu1 %vm379_vm0, %v362_v63  ;;  %v282_v34 = vld [vmem:[#allocation7 + $0x588] sm:$0xff] }
  0x30   :  { %v273_v36 = vld [vmem:[#allocation7 + $0x540] sm:$0xff]  ;;  %505 = vmatpush.msrb.mxu1 %v213_v35  ;;  %v350_v35 = vld [vmem:[#allocation7 + $0x7a8] sm:$0xff] }
  0x31   :  { %v341_v37 = vld [vmem:[#allocation7 + $0x760] sm:$0xff]  ;;  %529 = vmatpush.msrb.mxu2 %v273_v36  ;;  %v150_v36 = vld [vmem:[#allocation7 + $0x168] sm:$0xff] }
  0x32   :  { %v141_v38 = vld [vmem:[#allocation7 + $0x120] sm:$0xff]  ;;  %551 = vmatpush.msrb.mxu3 %v341_v37  ;;  %v218_v37 = vld [vmem:[#allocation7 + $0x388] sm:$0xff] }
  0x33   :  { %v209_v39 = vld [vmem:[#allocation7 + $0x340] sm:$0xff]  ;;  %484 = vmatpush.msrb.mxu0 %v141_v38  ;;  %v278_v38 = vld [vmem:[#allocation7 + $0x568] sm:$0xff] }
  0x34   :  { %v269_v40 = vld [vmem:[#allocation7 + $0x520] sm:$0xff]  ;;  %506 = vmatpush.msrb.mxu1 %v209_v39  ;;  %v346_v39 = vld [vmem:[#allocation7 + $0x788] sm:$0xff] }
  0x35   :  { %v337_v41 = vld [vmem:[#allocation7 + $0x740] sm:$0xff]  ;;  %530 = vmatpush.msrb.mxu2 %v269_v40  ;;  %v146_v40 = vld [vmem:[#allocation7 + $0x148] sm:$0xff] }
  0x36   :  { %v137_v42 = vld [vmem:[#allocation7 + $0x100] sm:$0xff]  ;;  %552 = vmatpush.msrb.mxu3 %v337_v41  ;;  %v214_v41 = vld [vmem:[#allocation7 + $0x368] sm:$0xff] }
  0x37   :  { %v205_v43 = vld [vmem:[#allocation7 + $0x320] sm:$0xff]  ;;  %485 = vmatpush.msrb.mxu0 %v137_v42  ;;  %v274_v42 = vld [vmem:[#allocation7 + $0x548] sm:$0xff] }
  0x38   :  { %v265_v44 = vld [vmem:[#allocation7 + $0x500] sm:$0xff]  ;;  %507 = vmatpush.msrb.mxu1 %v205_v43  ;;  %v342_v43 = vld [vmem:[#allocation7 + $0x768] sm:$0xff] }
  0x39   :  { %v333_v45 = vld [vmem:[#allocation7 + $0x720] sm:$0xff]  ;;  %531 = vmatpush.msrb.mxu2 %v265_v44  ;;  %v142_v44 = vld [vmem:[#allocation7 + $0x128] sm:$0xff] }
  0x3a   :  { %v133_v47 = vld [vmem:[#allocation7 + $0xe0] sm:$0xff]  ;;  %553 = vmatpush.msrb.mxu3 %v333_v45  ;;  %v210_v45 = vld [vmem:[#allocation7 + $0x348] sm:$0xff] }
  0x3b   :  { %v201_v48 = vld [vmem:[#allocation7 + $0x300] sm:$0xff]  ;;  %486 = vmatpush.msrb.mxu0 %v133_v47  ;;  %v270_v46 = vld [vmem:[#allocation7 + $0x528] sm:$0xff] }
  0x3c   :  { %v261_v49 = vld [vmem:[#allocation7 + $0x4e0] sm:$0xff]  ;;  %508 = vmatpush.msrb.mxu1 %v201_v48  ;;  %v338_v47 = vld [vmem:[#allocation7 + $0x748] sm:$0xff] }
  0x3d   :  { %v329_v50 = vld [vmem:[#allocation7 + $0x700] sm:$0xff]  ;;  %532 = vmatpush.msrb.mxu2 %v261_v49  ;;  %v138_v48 = vld [vmem:[#allocation7 + $0x108] sm:$0xff] }
  0x3e   :  { %v129_v51 = vld [vmem:[#allocation7 + $0xc0] sm:$0xff]  ;;  %554 = vmatpush.msrb.mxu3 %v329_v50  ;;  %v206_v49 = vld [vmem:[#allocation7 + $0x328] sm:$0xff] }
  0x3f   :  { %v197_v52 = vld [vmem:[#allocation7 + $0x2e0] sm:$0xff]  ;;  %487 = vmatpush.msrb.mxu0 %v129_v51  ;;  %v266_v50 = vld [vmem:[#allocation7 + $0x508] sm:$0xff] }
  0x40   :  { %v257_v53 = vld [vmem:[#allocation7 + $0x4c0] sm:$0xff]  ;;  %509 = vmatpush.msrb.mxu1 %v197_v52  ;;  %v334_v51 = vld [vmem:[#allocation7 + $0x728] sm:$0xff] }
  0x41   :  { %v325_v54 = vld [vmem:[#allocation7 + $0x6e0] sm:$0xff]  ;;  %533 = vmatpush.msrb.mxu2 %v257_v53  ;;  %v134_v52 = vld [vmem:[#allocation7 + $0xe8] sm:$0xff] }
  0x42   :  { %v125_v55 = vld [vmem:[#allocation7 + $0xa0] sm:$0xff]  ;;  %555 = vmatpush.msrb.mxu3 %v325_v54  ;;  %v202_v53 = vld [vmem:[#allocation7 + $0x308] sm:$0xff] }
  0x43   :  { %v193_v56 = vld [vmem:[#allocation7 + $0x2c0] sm:$0xff]  ;;  %488 = vmatpush.msrb.mxu0 %v125_v55  ;;  %v262_v54 = vld [vmem:[#allocation7 + $0x4e8] sm:$0xff] }
  0x44   :  { %v253_v57 = vld [vmem:[#allocation7 + $0x4a0] sm:$0xff]  ;;  %510 = vmatpush.msrb.mxu1 %v193_v56  ;;  %v330_v55 = vld [vmem:[#allocation7 + $0x708] sm:$0xff] }
  0x45   :  { %v321_v58 = vld [vmem:[#allocation7 + $0x6c0] sm:$0xff]  ;;  %534 = vmatpush.msrb.mxu2 %v253_v57  ;;  %v130_v56 = vld [vmem:[#allocation7 + $0xc8] sm:$0xff] }
  0x46   :  { %v121_v59 = vld [vmem:[#allocation7 + $0x80] sm:$0xff]  ;;  %556 = vmatpush.msrb.mxu3 %v321_v58  ;;  %v198_v57 = vld [vmem:[#allocation7 + $0x2e8] sm:$0xff] }
  0x47   :  { %v189_v60 = vld [vmem:[#allocation7 + $0x2a0] sm:$0xff]  ;;  %489 = vmatpush.msrb.mxu0 %v121_v59  ;;  %v258_v58 = vld [vmem:[#allocation7 + $0x4c8] sm:$0xff] }
  0x48   :  { %v249_v61 = vld [vmem:[#allocation7 + $0x480] sm:$0xff]  ;;  %511 = vmatpush.msrb.mxu1 %v189_v60  ;;  %v326_v59 = vld [vmem:[#allocation7 + $0x6e8] sm:$0xff] }
  0x49   :  { %v317_v62 = vld [vmem:[#allocation7 + $0x6a0] sm:$0xff]  ;;  %535 = vmatpush.msrb.mxu2 %v249_v61  ;;  %v126_v60 = vld [vmem:[#allocation7 + $0xa8] sm:$0xff] }
  0x4a   :  { %v117_v0 = vld [vmem:[#allocation7 + $0x60] sm:$0xff]  ;;  %557 = vmatpush.msrb.mxu3 %v317_v62  ;;  %v194_v61 = vld [vmem:[#allocation7 + $0x2c8] sm:$0xff] }
  0x4b   :  { %v185_v1 = vld [vmem:[#allocation7 + $0x280] sm:$0xff]  ;;  %490 = vmatpush.msrb.mxu0 %v117_v0  ;;  %v254_v62 = vld [vmem:[#allocation7 + $0x4a8] sm:$0xff] }
  0x4c   :  { %v245_v2 = vld [vmem:[#allocation7 + $0x460] sm:$0xff]  ;;  %512 = vmatpush.msrb.mxu1 %v185_v1  ;;  %v322_v63 = vld [vmem:[#allocation7 + $0x6c8] sm:$0xff] }
  0x4d   :  { %v313_v3 = vld [vmem:[#allocation7 + $0x680] sm:$0xff]  ;;  %536 = vmatpush.msrb.mxu2 %v245_v2  ;;  %v122_v0 = vld [vmem:[#allocation7 + $0x88] sm:$0xff] }
  0x4e   :  { %v113_v4 = vld [vmem:[#allocation7 + $0x40] sm:$0xff]  ;;  %558 = vmatpush.msrb.mxu3 %v313_v3  ;;  %v190_v1 = vld [vmem:[#allocation7 + $0x2a8] sm:$0xff] }
  0x4f   :  { %v181_v5 = vld [vmem:[#allocation7 + $0x260] sm:$0xff]  ;;  %491 = vmatpush.msrb.mxu0 %v113_v4  ;;  %v250_v2 = vld [vmem:[#allocation7 + $0x488] sm:$0xff]  ;;  %v1147_v4 = vld [vmem:[#allocation2 + $0x20] sm:$0xff] }
  0x50   :  { %v241_v6 = vld [vmem:[#allocation7 + $0x440] sm:$0xff]  ;;  %513 = vmatpush.msrb.mxu1 %v181_v5  ;;  %v318_v3 = vld [vmem:[#allocation7 + $0x6a8] sm:$0xff] }
  0x51   :  { %v309_v7 = vld [vmem:[#allocation7 + $0x660] sm:$0xff]  ;;  %537 = vmatpush.msrb.mxu2 %v241_v6  ;;  %v118_v6 = vld [vmem:[#allocation7 + $0x68] sm:$0xff] }
  0x52   :  { %v109_v8 = vld [vmem:[#allocation7 + $0x20] sm:$0xff]  ;;  %559 = vmatpush.msrb.mxu3 %v309_v7  ;;  %v186_v7 = vld [vmem:[#allocation7 + $0x288] sm:$0xff] }
  0x53   :  { %v177_v9 = vld [vmem:[#allocation7 + $0x240] sm:$0xff]  ;;  %492 = vmatpush.msrb.mxu0 %v109_v8  ;;  %v246_v8 = vld [vmem:[#allocation7 + $0x468] sm:$0xff] }
  0x54   :  { %v237_v10 = vld [vmem:[#allocation7 + $0x420] sm:$0xff]  ;;  %514 = vmatpush.msrb.mxu1 %v177_v9  ;;  %v314_v9 = vld [vmem:[#allocation7 + $0x688] sm:$0xff] }
  0x55   :  { %v305_v11 = vld [vmem:[#allocation7 + $0x640] sm:$0xff]  ;;  %538 = vmatpush.msrb.mxu2 %v237_v10  ;;  %v1153_v10 = vld [vmem:[#allocation2 + $0x28] sm:$0xff] }
  0x56   :  { %v105_v12 = vld [vmem:[#allocation7] sm:$0xff]  ;;  %560 = vmatpush.msrb.mxu3 %v305_v11  ;;  %v1155_v11 = vld [vmem:[#allocation2 + $0x38] sm:$0xff] }
  0x57   :  { %v173_v13 = vld [vmem:[#allocation7 + $0x220] sm:$0xff]  ;;  %493 = vmatpush.msrb.mxu0 %v105_v12  ;;  %v114_v12 = vld [vmem:[#allocation7 + $0x48] sm:$0xff] }
  0x58   :  { %v233_v14 = vld [vmem:[#allocation7 + $0x400] sm:$0xff]  ;;  %515 = vmatpush.msrb.mxu1 %v173_v13  ;;  %494 = vmatmul.f32.vlgmr.msrb.gmra.mxu0 %v1137_v21  ;;  %v182_v13 = vld [vmem:[#allocation7 + $0x268] sm:$0xff] }
  0x59   :  { %v301_v15 = vld [vmem:[#allocation7 + $0x620] sm:$0xff]  ;;  %539 = vmatpush.msrb.mxu2 %v233_v14  ;;  %570 = vmatpush.msra.mxu0 %v166_v17  ;;  %v242_v14 = vld [vmem:[#allocation7 + $0x448] sm:$0xff] }
  0x5a   :  { %v1135_v16 = vld [vmem:[#allocation2 + $0x10] sm:$0xff]  ;;  %561 = vmatpush.msrb.mxu3 %v301_v15  ;;  %v310_v15 = vld [vmem:[#allocation7 + $0x668] sm:$0xff] }
  0x5b   :  { %v169_v19 = vld [vmem:[#allocation7 + $0x200] sm:$0xff]  ;;  %540 = vmatmul.f32.vlgmr.msrb.gmra.mxu2 %v1135_v16  ;;  %571 = vmatpush.msra.mxu0 %v162_v23  ;;  %v110_v17 = vld [vmem:[#allocation7 + $0x28] sm:$0xff] }
  0x5c   :  { %v297_v20 = vld [vmem:[#allocation7 + $0x600] sm:$0xff]  ;;  %616 = vmatpush.msra.mxu2 %v294_v18  ;;  %516 = vmatpush.msrb.mxu1 %v169_v19  ;;  %v178_v18 = vld [vmem:[#allocation7 + $0x248] sm:$0xff] }
  0x5d   :  { %562 = vmatpush.msrb.mxu3 %v297_v20  ;;  %517 = vmatmul.f32.vlgmr.msrb.gmra.mxu1 %v1143_v27  ;;  %v1149_v5 = vld [vmem:[#allocation2 + $0x30] sm:$0xff]  ;;  %v238_v19 = vld [vmem:[#allocation7 + $0x428] sm:$0xff] }
  0x5e   :  { %563 = vmatmul.f32.vlgmr.msrb.gmra.mxu3 %v1140_v22  ;;  %593 = vmatpush.msra.mxu1 %v230_v24  ;;  %v306_v20 = vld [vmem:[#allocation7 + $0x648] sm:$0xff] }
  0x5f   :  { %617 = vmatpush.msra.mxu2 %v290_v25  ;;  %639 = vmatpush.msra.mxu3 %v358_v26  ;;  %v106_v23 = vld [vmem:[#allocation7 + $0x8] sm:$0xff] }
  0x60   :  { %572 = vmatpush.msra.mxu0 %v158_v28  ;;  %594 = vmatpush.msra.mxu1 %v226_v29  ;;  %v174_v24 = vld [vmem:[#allocation7 + $0x228] sm:$0xff]  ;;  %v167_v28 = vld [vmem:[#allocation7 + $0x1f0] sm:$0xff] }
  0x61   :  { %618 = vmatpush.msra.mxu2 %v286_v30  ;;  %640 = vmatpush.msra.mxu3 %v354_v31  ;;  %v234_v25 = vld [vmem:[#allocation7 + $0x408] sm:$0xff]  ;;  %v295_v29 = vld [vmem:[#allocation7 + $0x5f0] sm:$0xff] }
  0x62   :  { %573 = vmatpush.msra.mxu0 %v154_v32  ;;  %595 = vmatpush.msra.mxu1 %v222_v33  ;;  %v302_v26 = vld [vmem:[#allocation7 + $0x628] sm:$0xff]  ;;  %v163_v32 = vld [vmem:[#allocation7 + $0x1d0] sm:$0xff] }
  0x63   :  { %619 = vmatpush.msra.mxu2 %v282_v34  ;;  %641 = vmatpush.msra.mxu3 %v350_v35  ;;  %v170_v30 = vld [vmem:[#allocation7 + $0x208] sm:$0xff]  ;;  %v231_v33 = vld [vmem:[#allocation7 + $0x3f0] sm:$0xff] }
  0x64   :  { %574 = vmatpush.msra.mxu0 %v150_v36  ;;  %596 = vmatpush.msra.mxu1 %v218_v37  ;;  %v298_v31 = vld [vmem:[#allocation7 + $0x608] sm:$0xff]  ;;  %v291_v34 = vld [vmem:[#allocation7 + $0x5d0] sm:$0xff] }
  0x65   :  { %620 = vmatpush.msra.mxu2 %v278_v38  ;;  %642 = vmatpush.msra.mxu3 %v346_v39  ;;  %v359_v35 = vld [vmem:[#allocation7 + $0x7f0] sm:$0xff] }
  0x66   :  { %575 = vmatpush.msra.mxu0 %v146_v40  ;;  %597 = vmatpush.msra.mxu1 %v214_v41  ;;  %v159_v36 = vld [vmem:[#allocation7 + $0x1b0] sm:$0xff] }
  0x67   :  { %621 = vmatpush.msra.mxu2 %v274_v42  ;;  %643 = vmatpush.msra.mxu3 %v342_v43  ;;  %v227_v37 = vld [vmem:[#allocation7 + $0x3d0] sm:$0xff] }
  0x68   :  { %576 = vmatpush.msra.mxu0 %v142_v44  ;;  %598 = vmatpush.msra.mxu1 %v210_v45  ;;  %v287_v38 = vld [vmem:[#allocation7 + $0x5b0] sm:$0xff] }
  0x69   :  { %622 = vmatpush.msra.mxu2 %v270_v46  ;;  %644 = vmatpush.msra.mxu3 %v338_v47  ;;  %v355_v39 = vld [vmem:[#allocation7 + $0x7d0] sm:$0xff] }
  0x6a   :  { %577 = vmatpush.msra.mxu0 %v138_v48  ;;  %599 = vmatpush.msra.mxu1 %v206_v49  ;;  %v155_v40 = vld [vmem:[#allocation7 + $0x190] sm:$0xff] }
  0x6b   :  { %623 = vmatpush.msra.mxu2 %v266_v50  ;;  %645 = vmatpush.msra.mxu3 %v334_v51  ;;  %v223_v41 = vld [vmem:[#allocation7 + $0x3b0] sm:$0xff] }
  0x6c   :  { %578 = vmatpush.msra.mxu0 %v134_v52  ;;  %600 = vmatpush.msra.mxu1 %v202_v53  ;;  %v283_v42 = vld [vmem:[#allocation7 + $0x590] sm:$0xff] }
  0x6d   :  { %624 = vmatpush.msra.mxu2 %v262_v54  ;;  %646 = vmatpush.msra.mxu3 %v330_v55  ;;  %v351_v43 = vld [vmem:[#allocation7 + $0x7b0] sm:$0xff] }
  0x6e   :  { %579 = vmatpush.msra.mxu0 %v130_v56  ;;  %601 = vmatpush.msra.mxu1 %v198_v57  ;;  %v151_v44 = vld [vmem:[#allocation7 + $0x170] sm:$0xff] }
  0x6f   :  { %625 = vmatpush.msra.mxu2 %v258_v58  ;;  %647 = vmatpush.msra.mxu3 %v326_v59  ;;  %v219_v45 = vld [vmem:[#allocation7 + $0x390] sm:$0xff] }
  0x70   :  { %580 = vmatpush.msra.mxu0 %v126_v60  ;;  %602 = vmatpush.msra.mxu1 %v194_v61  ;;  %v279_v46 = vld [vmem:[#allocation7 + $0x570] sm:$0xff] }
  0x71   :  { %626 = vmatpush.msra.mxu2 %v254_v62  ;;  %648 = vmatpush.msra.mxu3 %v322_v63  ;;  %v347_v47 = vld [vmem:[#allocation7 + $0x790] sm:$0xff] }
  0x72   :  { %581 = vmatpush.msra.mxu0 %v122_v0  ;;  %603 = vmatpush.msra.mxu1 %v190_v1  ;;  %v147_v48 = vld [vmem:[#allocation7 + $0x150] sm:$0xff] }
  0x73   :  { %627 = vmatpush.msra.mxu2 %v250_v2  ;;  %649 = vmatpush.msra.mxu3 %v318_v3  ;;  %v215_v49 = vld [vmem:[#allocation7 + $0x370] sm:$0xff] }
  0x74   :  { %497 = vmatmul.f32.gmra.mxu0 %v1147_v4  ;;  %543 = vmatmul.f32.gmra.mxu2 %v1149_v5  ;;  %v275_v50 = vld [vmem:[#allocation7 + $0x550] sm:$0xff] }
  0x75   :  { %582 = vmatpush.msra.mxu0 %v118_v6  ;;  %604 = vmatpush.msra.mxu1 %v186_v7  ;;  %v343_v51 = vld [vmem:[#allocation7 + $0x770] sm:$0xff] }
  0x76   :  { %628 = vmatpush.msra.mxu2 %v246_v8  ;;  %650 = vmatpush.msra.mxu3 %v314_v9  ;;  %v143_v52 = vld [vmem:[#allocation7 + $0x130] sm:$0xff] }
  0x77   :  { %520 = vmatmul.f32.gmra.mxu1 %v1153_v10  ;;  %566 = vmatmul.f32.gmra.mxu3 %v1155_v11  ;;  %v211_v53 = vld [vmem:[#allocation7 + $0x350] sm:$0xff] }
  0x78   :  { %583 = vmatpush.msra.mxu0 %v114_v12  ;;  %605 = vmatpush.msra.mxu1 %v182_v13  ;;  %v271_v54 = vld [vmem:[#allocation7 + $0x530] sm:$0xff] }
  0x79   :  { %629 = vmatpush.msra.mxu2 %v242_v14  ;;  %651 = vmatpush.msra.mxu3 %v310_v15  ;;  %v339_v55 = vld [vmem:[#allocation7 + $0x750] sm:$0xff] }
  0x7a   :  { %584 = vmatpush.msra.mxu0 %v110_v17  ;;  %606 = vmatpush.msra.mxu1 %v178_v18  ;;  %v139_v56 = vld [vmem:[#allocation7 + $0x110] sm:$0xff] }
  0x7b   :  { %630 = vmatpush.msra.mxu2 %v238_v19  ;;  %652 = vmatpush.msra.mxu3 %v306_v20  ;;  %v207_v57 = vld [vmem:[#allocation7 + $0x330] sm:$0xff] }
  0x7c   :  { %585 = vmatpush.msra.mxu0 %v106_v23  ;;  %607 = vmatpush.msra.mxu1 %v174_v24  ;;  %v267_v58 = vld [vmem:[#allocation7 + $0x510] sm:$0xff] }
  0x7d   :  { %631 = vmatpush.msra.mxu2 %v234_v25  ;;  %653 = vmatpush.msra.mxu3 %v302_v26  ;;  %v335_v59 = vld [vmem:[#allocation7 + $0x730] sm:$0xff] }
  0x7e   :  { %586 = vmatmul.f32.vlgmr.msra.gmra.mxu0 %v1137_v21  ;;  %632 = vmatmul.f32.vlgmr.msra.gmra.mxu2 %v1135_v16  ;;  %v135_v60 = vld [vmem:[#allocation7 + $0xf0] sm:$0xff] }
  0x7f   :  { %662 = vmatpush.msrb.mxu0 %v167_v28  ;;  %708 = vmatpush.msrb.mxu2 %v295_v29  ;;  %v203_v61 = vld [vmem:[#allocation7 + $0x310] sm:$0xff] }
  0x80   :  { %608 = vmatpush.msra.mxu1 %v170_v30  ;;  %654 = vmatpush.msra.mxu3 %v298_v31  ;;  %v263_v62 = vld [vmem:[#allocation7 + $0x4f0] sm:$0xff] }
  0x81   :  { %609 = vmatmul.f32.vlgmr.msra.gmra.mxu1 %v1143_v27  ;;  %655 = vmatmul.f32.vlgmr.msra.gmra.mxu3 %v1140_v22  ;;  %v331_v63 = vld [vmem:[#allocation7 + $0x710] sm:$0xff] }
  0x82   :  { %663 = vmatpush.msrb.mxu0 %v163_v32  ;;  %685 = vmatpush.msrb.mxu1 %v231_v33  ;;  %v131_v0 = vld [vmem:[#allocation7 + $0xd0] sm:$0xff] }
  0x83   :  { %709 = vmatpush.msrb.mxu2 %v291_v34  ;;  %731 = vmatpush.msrb.mxu3 %v359_v35  ;;  %v199_v1 = vld [vmem:[#allocation7 + $0x2f0] sm:$0xff] }
  0x84   :  { %664 = vmatpush.msrb.mxu0 %v159_v36  ;;  %686 = vmatpush.msrb.mxu1 %v227_v37  ;;  %v259_v2 = vld [vmem:[#allocation7 + $0x4d0] sm:$0xff]  ;;  %v168_v36 = vld [vmem:[#allocation7 + $0x1f8] sm:$0xff] }
  0x85   :  { %710 = vmatpush.msrb.mxu2 %v287_v38  ;;  %732 = vmatpush.msrb.mxu3 %v355_v39  ;;  %v327_v3 = vld [vmem:[#allocation7 + $0x6f0] sm:$0xff]  ;;  %v296_v37 = vld [vmem:[#allocation7 + $0x5f8] sm:$0xff] }
  0x86   :  { %665 = vmatpush.msrb.mxu0 %v155_v40  ;;  %687 = vmatpush.msrb.mxu1 %v223_v41  ;;  %v127_v6 = vld [vmem:[#allocation7 + $0xb0] sm:$0xff]  ;;  %v164_v40 = vld [vmem:[#allocation7 + $0x1d8] sm:$0xff] }
  0x87   :  { %711 = vmatpush.msrb.mxu2 %v283_v42  ;;  %733 = vmatpush.msrb.mxu3 %v351_v43  ;;  %v195_v7 = vld [vmem:[#allocation7 + $0x2d0] sm:$0xff]  ;;  %v232_v41 = vld [vmem:[#allocation7 + $0x3f8] sm:$0xff] }
  0x88   :  { %589 = vmatmul.f32.gmra.mxu0 %v1147_v4  ;;  %635 = vmatmul.f32.gmra.mxu2 %v1149_v5  ;;  %v255_v8 = vld [vmem:[#allocation7 + $0x4b0] sm:$0xff]  ;;  %v292_v42 = vld [vmem:[#allocation7 + $0x5d8] sm:$0xff] }
  0x89   :  { %666 = vmatpush.msrb.mxu0 %v151_v44  ;;  %688 = vmatpush.msrb.mxu1 %v219_v45  ;;  %v323_v9 = vld [vmem:[#allocation7 + $0x6d0] sm:$0xff]  ;;  %v360_v43 = vld [vmem:[#allocation7 + $0x7f8] sm:$0xff] }
  0x8a   :  { %712 = vmatpush.msrb.mxu2 %v279_v46  ;;  %734 = vmatpush.msrb.mxu3 %v347_v47  ;;  %v123_v12 = vld [vmem:[#allocation7 + $0x90] sm:$0xff]  ;;  %v160_v44 = vld [vmem:[#allocation7 + $0x1b8] sm:$0xff] }
  0x8b   :  { %612 = vmatmul.f32.gmra.mxu1 %v1153_v10  ;;  %658 = vmatmul.f32.gmra.mxu3 %v1155_v11  ;;  %v191_v13 = vld [vmem:[#allocation7 + $0x2b0] sm:$0xff]  ;;  %v228_v45 = vld [vmem:[#allocation7 + $0x3d8] sm:$0xff] }
  0x8c   :  { %667 = vmatpush.msrb.mxu0 %v147_v48  ;;  %689 = vmatpush.msrb.mxu1 %v215_v49  ;;  %v251_v14 = vld [vmem:[#allocation7 + $0x490] sm:$0xff]  ;;  %v288_v46 = vld [vmem:[#allocation7 + $0x5b8] sm:$0xff] }
  0x8d   :  { %713 = vmatpush.msrb.mxu2 %v275_v50  ;;  %735 = vmatpush.msrb.mxu3 %v343_v51  ;;  %v319_v15 = vld [vmem:[#allocation7 + $0x6b0] sm:$0xff]  ;;  %v356_v47 = vld [vmem:[#allocation7 + $0x7d8] sm:$0xff] }
  0x8e   :  { %668 = vmatpush.msrb.mxu0 %v143_v52  ;;  %690 = vmatpush.msrb.mxu1 %v211_v53  ;;  %v119_v17 = vld [vmem:[#allocation7 + $0x70] sm:$0xff]  ;;  %v156_v48 = vld [vmem:[#allocation7 + $0x198] sm:$0xff] }
  0x8f   :  { %714 = vmatpush.msrb.mxu2 %v271_v54  ;;  %736 = vmatpush.msrb.mxu3 %v339_v55  ;;  %v187_v18 = vld [vmem:[#allocation7 + $0x290] sm:$0xff]  ;;  %v224_v49 = vld [vmem:[#allocation7 + $0x3b8] sm:$0xff] }
  0x90   :  { %669 = vmatpush.msrb.mxu0 %v139_v56  ;;  %691 = vmatpush.msrb.mxu1 %v207_v57  ;;  %v247_v19 = vld [vmem:[#allocation7 + $0x470] sm:$0xff]  ;;  %v284_v50 = vld [vmem:[#allocation7 + $0x598] sm:$0xff] }
  0x91   :  { %715 = vmatpush.msrb.mxu2 %v267_v58  ;;  %737 = vmatpush.msrb.mxu3 %v335_v59  ;;  %v315_v20 = vld [vmem:[#allocation7 + $0x690] sm:$0xff]  ;;  %v352_v51 = vld [vmem:[#allocation7 + $0x7b8] sm:$0xff] }
  0x92   :  { %670 = vmatpush.msrb.mxu0 %v135_v60  ;;  %692 = vmatpush.msrb.mxu1 %v203_v61  ;;  %v115_v23 = vld [vmem:[#allocation7 + $0x50] sm:$0xff]  ;;  %v152_v52 = vld [vmem:[#allocation7 + $0x178] sm:$0xff] }
  0x93   :  { %716 = vmatpush.msrb.mxu2 %v263_v62  ;;  %738 = vmatpush.msrb.mxu3 %v331_v63  ;;  %v183_v24 = vld [vmem:[#allocation7 + $0x270] sm:$0xff]  ;;  %v220_v53 = vld [vmem:[#allocation7 + $0x398] sm:$0xff] }
  0x94   :  { %671 = vmatpush.msrb.mxu0 %v131_v0  ;;  %693 = vmatpush.msrb.mxu1 %v199_v1  ;;  %v243_v25 = vld [vmem:[#allocation7 + $0x450] sm:$0xff]  ;;  %v280_v54 = vld [vmem:[#allocation7 + $0x578] sm:$0xff] }
  0x95   :  { %717 = vmatpush.msrb.mxu2 %v259_v2  ;;  %739 = vmatpush.msrb.mxu3 %v327_v3  ;;  %v311_v26 = vld [vmem:[#allocation7 + $0x670] sm:$0xff]  ;;  %v348_v55 = vld [vmem:[#allocation7 + $0x798] sm:$0xff] }
  0x96   :  { %672 = vmatpush.msrb.mxu0 %v127_v6  ;;  %694 = vmatpush.msrb.mxu1 %v195_v7  ;;  %v111_v28 = vld [vmem:[#allocation7 + $0x30] sm:$0xff]  ;;  %v148_v56 = vld [vmem:[#allocation7 + $0x158] sm:$0xff] }
  0x97   :  { %718 = vmatpush.msrb.mxu2 %v255_v8  ;;  %740 = vmatpush.msrb.mxu3 %v323_v9  ;;  %v179_v29 = vld [vmem:[#allocation7 + $0x250] sm:$0xff]  ;;  %v216_v57 = vld [vmem:[#allocation7 + $0x378] sm:$0xff] }
  0x98   :  { %673 = vmatpush.msrb.mxu0 %v123_v12  ;;  %695 = vmatpush.msrb.mxu1 %v191_v13  ;;  %v239_v30 = vld [vmem:[#allocation7 + $0x430] sm:$0xff]  ;;  %v276_v58 = vld [vmem:[#allocation7 + $0x558] sm:$0xff] }
  0x99   :  { %719 = vmatpush.msrb.mxu2 %v251_v14  ;;  %741 = vmatpush.msrb.mxu3 %v319_v15  ;;  %v307_v31 = vld [vmem:[#allocation7 + $0x650] sm:$0xff]  ;;  %v344_v59 = vld [vmem:[#allocation7 + $0x778] sm:$0xff] }
  0x9a   :  { %674 = vmatpush.msrb.mxu0 %v119_v17  ;;  %696 = vmatpush.msrb.mxu1 %v187_v18  ;;  %v107_v32 = vld [vmem:[#allocation7 + $0x10] sm:$0xff]  ;;  %v144_v60 = vld [vmem:[#allocation7 + $0x138] sm:$0xff] }
  0x9b   :  { %720 = vmatpush.msrb.mxu2 %v247_v19  ;;  %742 = vmatpush.msrb.mxu3 %v315_v20  ;;  %v175_v33 = vld [vmem:[#allocation7 + $0x230] sm:$0xff]  ;;  %v212_v61 = vld [vmem:[#allocation7 + $0x358] sm:$0xff] }
  0x9c   :  { %675 = vmatpush.msrb.mxu0 %v115_v23  ;;  %697 = vmatpush.msrb.mxu1 %v183_v24  ;;  %v235_v34 = vld [vmem:[#allocation7 + $0x410] sm:$0xff]  ;;  %v272_v62 = vld [vmem:[#allocation7 + $0x538] sm:$0xff] }
  0x9d   :  { %721 = vmatpush.msrb.mxu2 %v243_v25  ;;  %743 = vmatpush.msrb.mxu3 %v311_v26  ;;  %v303_v35 = vld [vmem:[#allocation7 + $0x630] sm:$0xff]  ;;  %v340_v63 = vld [vmem:[#allocation7 + $0x758] sm:$0xff] }
  0x9e   :  { %676 = vmatpush.msrb.mxu0 %v111_v28  ;;  %698 = vmatpush.msrb.mxu1 %v179_v29  ;;  %v171_v38 = vld [vmem:[#allocation7 + $0x210] sm:$0xff]  ;;  %v140_v0 = vld [vmem:[#allocation7 + $0x118] sm:$0xff] }
  0x9f   :  { %722 = vmatpush.msrb.mxu2 %v239_v30  ;;  %744 = vmatpush.msrb.mxu3 %v307_v31  ;;  %v299_v39 = vld [vmem:[#allocation7 + $0x610] sm:$0xff]  ;;  %v208_v1 = vld [vmem:[#allocation7 + $0x338] sm:$0xff] }
  0xa0   :  { %677 = vmatpush.msrb.mxu0 %v107_v32  ;;  %699 = vmatpush.msrb.mxu1 %v175_v33  ;;  %v268_v2 = vld [vmem:[#allocation7 + $0x518] sm:$0xff] }
  0xa1   :  { %723 = vmatpush.msrb.mxu2 %v235_v34  ;;  %745 = vmatpush.msrb.mxu3 %v303_v35  ;;  %v336_v3 = vld [vmem:[#allocation7 + $0x738] sm:$0xff] }
  0xa2   :  { %678 = vmatmul.f32.vlgmr.msrb.gmra.mxu0 %v1137_v21  ;;  %724 = vmatmul.f32.vlgmr.msrb.gmra.mxu2 %v1135_v16  ;;  %v136_v6 = vld [vmem:[#allocation7 + $0xf8] sm:$0xff] }
  0xa3   :  { %754 = vmatpush.msra.mxu0 %v168_v36  ;;  %800 = vmatpush.msra.mxu2 %v296_v37  ;;  %v204_v7 = vld [vmem:[#allocation7 + $0x318] sm:$0xff] }
  0xa4   :  { %700 = vmatpush.msrb.mxu1 %v171_v38  ;;  %746 = vmatpush.msrb.mxu3 %v299_v39  ;;  %v264_v8 = vld [vmem:[#allocation7 + $0x4f8] sm:$0xff] }
  0xa5   :  { %701 = vmatmul.f32.vlgmr.msrb.gmra.mxu1 %v1143_v27  ;;  %747 = vmatmul.f32.vlgmr.msrb.gmra.mxu3 %v1140_v22  ;;  %v332_v9 = vld [vmem:[#allocation7 + $0x718] sm:$0xff] }
  0xa6   :  { %755 = vmatpush.msra.mxu0 %v164_v40  ;;  %777 = vmatpush.msra.mxu1 %v232_v41  ;;  %v132_v12 = vld [vmem:[#allocation7 + $0xd8] sm:$0xff] }
  0xa7   :  { %801 = vmatpush.msra.mxu2 %v292_v42  ;;  %823 = vmatpush.msra.mxu3 %v360_v43  ;;  %v200_v13 = vld [vmem:[#allocation7 + $0x2f8] sm:$0xff] }
  0xa8   :  { %756 = vmatpush.msra.mxu0 %v160_v44  ;;  %778 = vmatpush.msra.mxu1 %v228_v45  ;;  %v260_v14 = vld [vmem:[#allocation7 + $0x4d8] sm:$0xff] }
  0xa9   :  { %802 = vmatpush.msra.mxu2 %v288_v46  ;;  %824 = vmatpush.msra.mxu3 %v356_v47  ;;  %v328_v15 = vld [vmem:[#allocation7 + $0x6f8] sm:$0xff]  ;;  %v403_v46 = vpop.f32.mrf.mxu0  ;;  %v426_v47 = vpop.f32.mrf.mxu1 }
  0xaa   :  { %757 = vmatpush.msra.mxu0 %v156_v48  ;;  %779 = vmatpush.msra.mxu1 %v224_v49  ;;  %v128_v17 = vld [vmem:[#allocation7 + $0xb8] sm:$0xff]  ;;  %v449_v48 = vpop.f32.mrf.mxu2  ;;  %v1179_v49 = vpop.f32.mrf.mxu3 }
  0xab   :  { %803 = vmatpush.msra.mxu2 %v284_v50  ;;  %825 = vmatpush.msra.mxu3 %v352_v51  ;;  %v196_v18 = vld [vmem:[#allocation7 + $0x2d8] sm:$0xff] }
  0xac   :  { %681 = vmatmul.f32.gmra.mxu0 %v1147_v4  ;;  %727 = vmatmul.f32.gmra.mxu2 %v1149_v5  ;;  %v256_v19 = vld [vmem:[#allocation7 + $0x4b8] sm:$0xff] }
  0xad   :  { %758 = vmatpush.msra.mxu0 %v152_v52  ;;  %780 = vmatpush.msra.mxu1 %v220_v53  ;;  %v324_v20 = vld [vmem:[#allocation7 + $0x6d8] sm:$0xff]  ;;  %v1187_v53 = vld [vmem:[#allocation10] sm:$0xf] }
  0xae   :  { %804 = vmatpush.msra.mxu2 %v280_v54  ;;  %826 = vmatpush.msra.mxu3 %v348_v55  ;;  %v124_v23 = vld [vmem:[#allocation7 + $0x98] sm:$0xff] }
  0xaf   :  { %704 = vmatmul.f32.gmra.mxu1 %v1153_v10  ;;  %750 = vmatmul.f32.gmra.mxu3 %v1155_v11  ;;  %v192_v24 = vld [vmem:[#allocation7 + $0x2b8] sm:$0xff] }
  0xb0   :  { %759 = vmatpush.msra.mxu0 %v148_v56  ;;  %781 = vmatpush.msra.mxu1 %v216_v57  ;;  %v252_v25 = vld [vmem:[#allocation7 + $0x498] sm:$0xff] }
  0xb1   :  { %805 = vmatpush.msra.mxu2 %v276_v58  ;;  %827 = vmatpush.msra.mxu3 %v344_v59  ;;  %v320_v26 = vld [vmem:[#allocation7 + $0x6b8] sm:$0xff]  ;;  %v406_v50 = vpop.f32.mrf.mxu0 }
  0xb2   :  { %760 = vmatpush.msra.mxu0 %v144_v60  ;;  %782 = vmatpush.msra.mxu1 %v212_v61  ;;  %v120_v28 = vld [vmem:[#allocation7 + $0x78] sm:$0xff]  ;;  %v1185_v51 = vpop.f32.mrf.mxu3 }
  0xb3   :  { %806 = vmatpush.msra.mxu2 %v272_v62  ;;  %828 = vmatpush.msra.mxu3 %v340_v63  ;;  %v188_v29 = vld [vmem:[#allocation7 + $0x298] sm:$0xff] }
  0xb4   :  { %761 = vmatpush.msra.mxu0 %v140_v0  ;;  %783 = vmatpush.msra.mxu1 %v208_v1  ;;  %v248_v30 = vld [vmem:[#allocation7 + $0x478] sm:$0xff] }
  0xb5   :  { %807 = vmatpush.msra.mxu2 %v268_v2  ;;  %829 = vmatpush.msra.mxu3 %v336_v3  ;;  %v316_v31 = vld [vmem:[#allocation7 + $0x698] sm:$0xff] }
  0xb6   :  { %762 = vmatpush.msra.mxu0 %v136_v6  ;;  %784 = vmatpush.msra.mxu1 %v204_v7  ;;  %v116_v32 = vld [vmem:[#allocation7 + $0x58] sm:$0xff] }
  0xb7   :  { %808 = vmatpush.msra.mxu2 %v264_v8  ;;  %830 = vmatpush.msra.mxu3 %v332_v9  ;;  %v184_v33 = vld [vmem:[#allocation7 + $0x278] sm:$0xff] }
  0xb8   :  { %763 = vmatpush.msra.mxu0 %v132_v12  ;;  %785 = vmatpush.msra.mxu1 %v200_v13  ;;  %v244_v34 = vld [vmem:[#allocation7 + $0x458] sm:$0xff]  ;;  %v849_v12 = vperm.slane %v1187_v53, 1 }
  0xb9   :  { %809 = vmatpush.msra.mxu2 %v260_v14  ;;  %831 = vmatpush.msra.mxu3 %v328_v15  ;;  %v312_v35 = vld [vmem:[#allocation7 + $0x678] sm:$0xff] }
  0xba   :  { %764 = vmatpush.msra.mxu0 %v128_v17  ;;  %786 = vmatpush.msra.mxu1 %v196_v18  ;;  %v112_v36 = vld [vmem:[#allocation7 + $0x38] sm:$0xff] }
  0xbb   :  { %810 = vmatpush.msra.mxu2 %v256_v19  ;;  %832 = vmatpush.msra.mxu3 %v324_v20  ;;  %v180_v37 = vld [vmem:[#allocation7 + $0x258] sm:$0xff] }
  0xbc   :  { %765 = vmatpush.msra.mxu0 %v124_v23  ;;  %787 = vmatpush.msra.mxu1 %v192_v24  ;;  %v240_v38 = vld [vmem:[#allocation7 + $0x438] sm:$0xff] }
  0xbd   :  { %811 = vmatpush.msra.mxu2 %v252_v25  ;;  %833 = vmatpush.msra.mxu3 %v320_v26  ;;  %v308_v39 = vld [vmem:[#allocation7 + $0x658] sm:$0xff] }
  0xbe   :  { %766 = vmatpush.msra.mxu0 %v120_v28  ;;  %788 = vmatpush.msra.mxu1 %v188_v29  ;;  %v108_v40 = vld [vmem:[#allocation7 + $0x18] sm:$0xff] }
  0xbf   :  { %812 = vmatpush.msra.mxu2 %v248_v30  ;;  %834 = vmatpush.msra.mxu3 %v316_v31  ;;  %v176_v41 = vld [vmem:[#allocation7 + $0x238] sm:$0xff] }
  0xc0   :  { %767 = vmatpush.msra.mxu0 %v116_v32  ;;  %789 = vmatpush.msra.mxu1 %v184_v33  ;;  %v236_v42 = vld [vmem:[#allocation7 + $0x418] sm:$0xff] }
  0xc1   :  { %813 = vmatpush.msra.mxu2 %v244_v34  ;;  %835 = vmatpush.msra.mxu3 %v312_v35  ;;  %v304_v43 = vld [vmem:[#allocation7 + $0x638] sm:$0xff]  ;;  %v850_v35 = vperm.slane %v1187_v53, 2 }
  0xc2   :  { %768 = vmatpush.msra.mxu0 %v112_v36  ;;  %790 = vmatpush.msra.mxu1 %v180_v37  ;;  %v172_v44 = vld [vmem:[#allocation7 + $0x218] sm:$0xff] }
  0xc3   :  { %814 = vmatpush.msra.mxu2 %v240_v38  ;;  %836 = vmatpush.msra.mxu3 %v308_v39  ;;  %v300_v45 = vld [vmem:[#allocation7 + $0x618] sm:$0xff] }
  0xc4   :  { %769 = vmatpush.msra.mxu0 %v108_v40  ;;  %791 = vmatpush.msra.mxu1 %v176_v41 }
  0xc5   :  { %815 = vmatpush.msra.mxu2 %v236_v42  ;;  %837 = vmatpush.msra.mxu3 %v304_v43 }
  0xc6   :  { %770 = vmatmul.f32.vlgmr.msra.gmra.mxu0 %v1137_v21  ;;  %816 = vmatmul.f32.vlgmr.msra.gmra.mxu2 %v1135_v16  ;;  %v429_v16 = vpop.f32.mrf.mxu1  ;;  %v452_v21 = vpop.f32.mrf.mxu2 }
  0xc7   :  { %792 = vmatpush.msra.mxu1 %v172_v44  ;;  %838 = vmatpush.msra.mxu3 %v300_v45 }
  0xc8   :  { %793 = vmatmul.f32.vlgmr.msra.gmra.mxu1 %v1143_v27  ;;  %839 = vmatmul.f32.vlgmr.msra.gmra.mxu3 %v1140_v22 }
  0xce   :  { %773 = vmatmul.f32.gmra.mxu0 %v1147_v4  ;;  %819 = vmatmul.f32.gmra.mxu2 %v1149_v5  ;;  %v848_v4 = vperm.slane %v1187_v53, 0 }
  0xd0   :  { %796 = vmatmul.f32.gmra.mxu1 %v1153_v10  ;;  %842 = vmatmul.f32.gmra.mxu3 %v1155_v11 }
  0xd5   :  { %v495_v27 = vpop.f32.mrf.mxu0 }
  0xd6   :  { %v496_v52 = vadd.f32 %v495_v27, %v403_v46 }
  0xda   :  { %v518_v22 = vpop.f32.mrf.mxu1 }
  0xdb   :  { %v519_v54 = vadd.f32 %v518_v22, %v496_v52 }
  0xde   :  { %v541_v55 = vpop.f32.mrf.mxu2 }
  0xdf   :  { %v542_v56 = vadd.f32 %v541_v55, %v519_v54  ;;  %v851_v54 = vperm.slane %v1187_v53, 3 }
  0xe1   :  { %v564_v5 = vpop.f32.mrf.mxu3 }
  0xe2   :  { %v565_v57 = vadd.f32 %v564_v5, %v542_v56 }
  0xe4   :  { %v856_v58 = vadd.f32 %v848_v4, %v565_v57 }
  0xe6   :  { %864 = vst [vmem:[#allocation11] sm:$0xff] %v856_v58 }
  0xf1   :  { %v498_v10 = vpop.f32.mrf.mxu0 }
  0xf2   :  { %v499_v11 = vadd.f32 %v498_v10, %v406_v50 }
  0xf4   :  { %v521_v59 = vpop.f32.mrf.mxu1 }
  0xf5   :  { %v522_v60 = vadd.f32 %v521_v59, %v499_v11 }
  0xf7   :  { %v544_v61 = vpop.f32.mrf.mxu2 }
  0xf8   :  { %v545_v62 = vadd.f32 %v544_v61, %v522_v60 }
  0xfa   :  { %v567_v63 = vpop.f32.mrf.mxu3 }
  0xfb   :  { %v568_v0 = vadd.f32 %v567_v63, %v545_v62  ;;  %v587_v1 = vpop.f32.mrf.mxu0 }
  0xfc   :  { %v588_v2 = vadd.f32 %v587_v1, %v426_v47 }
  0xfd   :  { %v860_v3 = vadd.f32 %v848_v4, %v568_v0 }
  0xfe   :  { %v610_v6 = vpop.f32.mrf.mxu1 }
  0xff   :  { %868 = vst [vmem:[#allocation11 + $0x20] sm:$0xff] %v860_v3  ;;  %v611_v7 = vadd.f32 %v610_v6, %v588_v2 }
 0x101   :  { %v633_v8 = vpop.f32.mrf.mxu2 }
 0x102   :  { %v634_v9 = vadd.f32 %v633_v8, %v611_v7 }
 0x104   :  { %v656_v13 = vpop.f32.mrf.mxu3 }
 0x105   :  { %v590_v14 = vpop.f32.mrf.mxu0  ;;  %v657_v15 = vadd.f32 %v656_v13, %v634_v9 }
 0x106   :  { %v591_v17 = vadd.f32 %v590_v14, %v429_v16 }
 0x107   :  { %v857_v18 = vadd.f32 %v849_v12, %v657_v15 }
 0x108   :  { %v613_v19 = vpop.f32.mrf.mxu1 }
 0x109   :  { %865 = vst [vmem:[#allocation11 + $0x8] sm:$0xff] %v857_v18  ;;  %v614_v20 = vadd.f32 %v613_v19, %v591_v17 }
 0x10b   :  { %v636_v23 = vpop.f32.mrf.mxu2 }
 0x10c   :  { %v637_v24 = vadd.f32 %v636_v23, %v614_v20 }
 0x10e   :  { %v659_v25 = vpop.f32.mrf.mxu3 }
 0x10f   :  { %v660_v26 = vadd.f32 %v659_v25, %v637_v24 }
 0x111   :  { %v861_v28 = vadd.f32 %v849_v12, %v660_v26 }
 0x113   :  { %869 = vst [vmem:[#allocation11 + $0x28] sm:$0xff] %v861_v28 }
 0x11f   :  { %v679_v29 = vpop.f32.mrf.mxu0 }
 0x120   :  { %v680_v30 = vadd.f32 %v679_v29, %v449_v48 }
 0x122   :  { %v702_v31 = vpop.f32.mrf.mxu1 }
 0x123   :  { %v703_v32 = vadd.f32 %v702_v31, %v680_v30 }
 0x125   :  { %v725_v33 = vpop.f32.mrf.mxu2 }
 0x126   :  { %v726_v34 = vadd.f32 %v725_v33, %v703_v32 }
 0x128   :  { %v748_v36 = vpop.f32.mrf.mxu3 }
 0x129   :  { %v682_v37 = vpop.f32.mrf.mxu0  ;;  %v749_v38 = vadd.f32 %v748_v36, %v726_v34 }
 0x12a   :  { %v683_v39 = vadd.f32 %v682_v37, %v452_v21 }
 0x12b   :  { %v858_v40 = vadd.f32 %v850_v35, %v749_v38 }
 0x12c   :  { %v705_v41 = vpop.f32.mrf.mxu1 }
 0x12d   :  { %866 = vst [vmem:[#allocation11 + $0x10] sm:$0xff] %v858_v40  ;;  %v706_v42 = vadd.f32 %v705_v41, %v683_v39 }
 0x12f   :  { %v728_v43 = vpop.f32.mrf.mxu2 }
 0x130   :  { %v729_v44 = vadd.f32 %v728_v43, %v706_v42 }
 0x132   :  { %v751_v45 = vpop.f32.mrf.mxu3 }
 0x133   :  { %v752_v46 = vadd.f32 %v751_v45, %v729_v44 }
 0x135   :  { %v862_v47 = vadd.f32 %v850_v35, %v752_v46 }
 0x137   :  { %870 = vst [vmem:[#allocation11 + $0x30] sm:$0xff] %v862_v47 }
 0x143   :  { %v771_v48 = vpop.f32.mrf.mxu0 }
 0x144   :  { %v772_v50 = vadd.f32 %v771_v48, %v1179_v49 }
 0x145   :  { %v794_v16 = vpop.f32.mrf.mxu1 }
 0x146   :  { %v795_v27 = vadd.f32 %v794_v16, %v772_v50 }
 0x149   :  { %v817_v52 = vpop.f32.mrf.mxu2 }
 0x14a   :  { %v818_v22 = vadd.f32 %v817_v52, %v795_v27 }
 0x14b   :  { %v774_v21 = vpop.f32.mrf.mxu0  ;;  %v840_v55 = vpop.f32.mrf.mxu3 }
 0x14c   :  { %v775_v56 = vadd.f32 %v774_v21, %v1185_v51  ;;  %v841_v4 = vadd.f32 %v840_v55, %v818_v22 }
 0x14d   :  { %v797_v5 = vpop.f32.mrf.mxu1 }
 0x14e   :  { %v859_v57 = vadd.f32 %v851_v54, %v841_v4  ;;  %v798_v58 = vadd.f32 %v797_v5, %v775_v56 }
 0x150   :  { %867 = vst [vmem:[#allocation11 + $0x18] sm:$0xff] %v859_v57 }
 0x151   :  { %v820_v10 = vpop.f32.mrf.mxu2 }
 0x152   :  { %v821_v11 = vadd.f32 %v820_v10, %v798_v58 }
 0x153   :  { %v843_v59 = vpop.f32.mrf.mxu3 }
 0x154   :  { %v844_v49 = vadd.f32 %v843_v59, %v821_v11 }
 0x156   :  { %v863_v53 = vadd.f32 %v851_v54, %v844_v49 }
 0x158   :  { %871 = vst [vmem:[#allocation11 + $0x38] sm:$0xff] %v863_v53 }
 0x159   :  { %884 = dma.vmem_to_hbm [thread:$0]  %s877_s18, 1024, %s879_s21, [#allocation4], %s1067_s1, %s1067_s1, %s1068_s8  }
 0x15a   :  { %1061 = dma.done.wait [#allocation4], 1024  }
 0x15b   :  { %1062 = vsyncadd [#allocation4], 4294966272 }
 0x15c   :  { %889 = vsyncpa [#allocation3], 1 }
 0x15d   :  { %890 = vsyncpa [#allocation6], 1 }
 0x15e   :  { %891 = vsyncpa [#allocation9], 1 }
 0x15f   :  { %892 = vsyncpa [#allocation4], 1 }

// kernel: tpu_custom_call.1
= control target key start
LH: loop header
LB: loop body
LE: loop exit
PB: predicated region body
PF: predicated region fallthrough
CT: control target
= control target key end

     0   :  { %10 = vsyncpa [#allocation3], 0  ;;  %s1201_s0 = inlined_call_operand.hbm [shape: f32[16,512], index: 0, kind: input, shape index: {}]   ;;  %s1202_s1 = inlined_call_operand.hbm [shape: f32[16,32], index: 1, kind: input, shape index: {}]   ;;  %s1203_s2 = inlined_call_operand.hbm [shape: f32[512,512], index: 2, kind: input, shape index: {}]   ;;  %s1204_s3 = inlined_call_operand.hbm [shape: f32[32,512], index: 3, kind: input, shape index: {}]   ;;  %s1205_s4 = inlined_call_operand.hbm [shape: f32[1,512], index: 4, kind: input, shape index: {}]   ;;  %s1206_s5 = inlined_call_operand.hbm [shape: f32[16,512], index: 5, kind: output, shape index: {}]  }
   0x1   :  { %11 = vsyncpa [#allocation6], 0 }
   0x2   :  { %12 = vsyncpa [#allocation9], 0  ;;  %s31_s20 = sshll.u32 %s1202_s1, 4  ;;  %s32_s20 = int_to_ptr.hbm [resolvable:$true] %s31_s20 }
   0x3   :  { %13 = vsyncpa [#allocation4], 0  ;;  %s1063_s21 = smov [#allocation5]   ;;  %s1064_s23 = smov 128  }
   0x4   :  { %s33_s22 = sshll.u32 %s1063_s21, 4  ;;  %s1065_s24 = smov 8   ;;  %s34_s22 = int_to_ptr.vmem [resolvable:$true] %s33_s22 }
   0x5   :  { %39 = dma.hbm_to_vmem [thread:$0]  %s32_s20, 256, %s34_s22, [#allocation6], %s1064_s23, %s1064_s23, %s1065_s24  }
   0x6   :  { %s57_s27 = sshll.u32 %s1204_s3, 4  ;;  %s1066_s28 = smov [#allocation8]   ;;  %s58_s27 = int_to_ptr.hbm [resolvable:$true] %s57_s27 }
   0x7   :  { %s59_s29 = sshll.u32 %s1066_s28, 4  ;;  %s18_s7 = sshll.u32 %s1201_s0, 4  ;;  %s60_s29 = int_to_ptr.vmem [resolvable:$true] %s59_s29  ;;  %s19_s7 = int_to_ptr.hbm [resolvable:$true] %s18_s7 }
   0x8   :  { %s1067_s1 = smov 512   ;;  %s1068_s8 = smov 32  }
   0x9   :  { %65 = dma.hbm_to_vmem [thread:$0]  %s58_s27, 2048, %s60_s29, [#allocation9], %s1067_s1, %s1067_s1, %s1068_s8  }
   0xa   :  { %s44_s11 = sshll.u32 %s1203_s2, 4  ;;  %s1069_s3 = smov [#allocation2]   ;;  %s45_s11 = int_to_ptr.hbm [resolvable:$true] %s44_s11 }
   0xb   :  { %s20_s12 = sshll.u32 %s1069_s3, 4  ;;  %s1070_s0 = smov [#allocation7]   ;;  %s21_s12 = int_to_ptr.vmem [resolvable:$true] %s20_s12 }
   0xc   :  { %26 = dma.hbm_to_vmem [thread:$0]  %s19_s7, 1024, %s21_s12, [#allocation3], %s1067_s1, %s1067_s1, %s1068_s8  }
   0xd   :  { %s46_s13 = sshll.u32 %s1070_s0, 4  ;;  %s71_s16 = sshll.u32 %s1205_s4, 4  ;;  %s47_s13 = int_to_ptr.vmem [resolvable:$true] %s46_s13  ;;  %s72_s16 = int_to_ptr.hbm [resolvable:$true] %s71_s16 }
   0xe   :  { %52 = dma.hbm_to_vmem [thread:$0]  %s45_s11, 32768, %s47_s13, [#allocation6], %s1067_s1, %s1067_s1, %s1068_s8  }
   0xf   :  { %s1071_s2 = smov [#allocation10]  }
  0x10   :  { %s73_s17 = sshll.u32 %s1071_s2, 4  ;;  %s74_s17 = int_to_ptr.vmem [resolvable:$true] %s73_s17 }
  0x11   :  { %76 = dma.hbm_to_vmem [thread:$0]  %s72_s16, 64, %s74_s17, [#allocation9]  }
  0x12   :  { %1055 = dma.done.wait [#allocation3], 1024  }
  0x13   :  { %1056 = vsyncadd [#allocation3], 4294966272 }
  0x14   :  { %1057 = dma.done.wait [#allocation6], 33024  }
  0x15   :  { %1058 = vsyncadd [#allocation6], 4294934272 }
  0x16   :  { %1059 = dma.done.wait [#allocation9], 2112  }
  0x17   :  { %1060 = vsyncadd [#allocation9], 4294965184  ;;  %v375_v0 = vld [vmem:[#allocation8 + $0x60] sm:$0xff]  ;;  %v377_v1 = vld [vmem:[#allocation8 + $0x70] sm:$0xff]  ;;  %vm379_vm0 = vcmask 261120   ;;  %s1072_s4 = smov [#allocation11]  }
  0x18   :  { %v371_v2 = vld [vmem:[#allocation8 + $0x40] sm:$0xff]  ;;  %398 = vmatpush.msra.mxu0 %v375_v0  ;;  %444 = vmatpush.msra.mxu2 %v377_v1  ;;  %v376_v3 = vld [vmem:[#allocation8 + $0x68] sm:$0xff]  ;;  %v373_v4 = vld [vmem:[#allocation8 + $0x50] sm:$0xff]  ;;  %s876_s18 = sshll.u32 %s1072_s4, 4  ;;  %s878_s21 = sshll.u32 %s1206_s5, 4  ;;  %s877_s18 = int_to_ptr.vmem [resolvable:$true] %s876_s18  ;;  %s879_s21 = int_to_ptr.hbm [resolvable:$true] %s878_s21 }
  0x19   :  { %v378_v5 = vld [vmem:[#allocation8 + $0x78] sm:$0xff]  ;;  %421 = vmatpush.msra.mxu1 %v376_v3  ;;  %v367_v6 = vld [vmem:[#allocation8 + $0x20] sm:$0xff]  ;;  %v372_v7 = vld [vmem:[#allocation8 + $0x48] sm:$0xff] }
  0x1a   :  { %467 = vmatpush.msra.mxu3 %v378_v5  ;;  %v369_v8 = vld [vmem:[#allocation8 + $0x30] sm:$0xff]  ;;  %399 = vmatpush.msra.mxu0 %v371_v2  ;;  %v374_v9 = vld [vmem:[#allocation8 + $0x58] sm:$0xff]  ;;  %v368_v10 = vld [vmem:[#allocation8 + $0x28] sm:$0xff] }
  0x1b   :  { %445 = vmatpush.msra.mxu2 %v373_v4  ;;  %422 = vmatpush.msra.mxu1 %v372_v7  ;;  %v363_v11 = vld [vmem:[#allocation8] sm:$0xff]  ;;  %v365_v12 = vld [vmem:[#allocation8 + $0x10] sm:$0xff]  ;;  %v370_v13 = vld [vmem:[#allocation8 + $0x38] sm:$0xff] }
  0x1c   :  { %468 = vmatpush.msra.mxu3 %v374_v9  ;;  %400 = vmatpush.msra.mxu0 %v367_v6  ;;  %v165_v14 = vld [vmem:[#allocation7 + $0x1e0] sm:$0xff]  ;;  %v364_v16 = vld [vmem:[#allocation8 + $0x8] sm:$0xff]  ;;  %v366_v17 = vld [vmem:[#allocation8 + $0x18] sm:$0xff] }
  0x1d   :  { %446 = vmatpush.msra.mxu2 %v369_v8  ;;  %v293_v15 = vld [vmem:[#allocation7 + $0x5e0] sm:$0xff]  ;;  %423 = vmatpush.msra.mxu1 %v368_v10  ;;  %v361_v46 = vld [vmem:[#allocation5] sm:$0xff]  ;;  %v362_v63 = vld [vmem:[#allocation5 + $0x8] sm:$0xff] }
  0x1e   :  { %469 = vmatpush.msra.mxu3 %v370_v13  ;;  %401 = vmatpush.msra.mxu0 %v363_v11  ;;  %v161_v18 = vld [vmem:[#allocation7 + $0x1c0] sm:$0xff] }
  0x1f   :  { %447 = vmatpush.msra.mxu2 %v365_v12  ;;  %v229_v19 = vld [vmem:[#allocation7 + $0x3e0] sm:$0xff]  ;;  %424 = vmatpush.msra.mxu1 %v364_v16 }
  0x20   :  { %478 = vmatpush.msrb.mxu0 %v165_v14  ;;  %v289_v20 = vld [vmem:[#allocation7 + $0x5c0] sm:$0xff]  ;;  %470 = vmatpush.msra.mxu3 %v366_v17  ;;  %v166_v17 = vld [vmem:[#allocation7 + $0x1e8] sm:$0xff] }
  0x21   :  { %524 = vmatpush.msrb.mxu2 %v293_v15  ;;  %v357_v21 = vld [vmem:[#allocation7 + $0x7e0] sm:$0xff]  ;;  %501 = vmatpush.msrb.mxu1 %v229_v19 }
  0x22   :  { %v157_v22 = vld [vmem:[#allocation7 + $0x1a0] sm:$0xff]  ;;  %479 = vmatpush.msrb.mxu0 %v161_v18  ;;  %547 = vmatpush.msrb.mxu3 %v357_v21  ;;  %v294_v18 = vld [vmem:[#allocation7 + $0x5e8] sm:$0xff]  ;;  %v1137_v21 = vld [vmem:[#allocation2] sm:$0xff] }
  0x23   :  { %v225_v23 = vld [vmem:[#allocation7 + $0x3c0] sm:$0xff]  ;;  %525 = vmatpush.msrb.mxu2 %v289_v20  ;;  %893 = vmatmul.msk.f32.vlgmr.msra.gmra.mxu0 %vm379_vm0, %v361_v46 }
  0x24   :  { %v285_v24 = vld [vmem:[#allocation7 + $0x5a0] sm:$0xff]  ;;  %480 = vmatpush.msrb.mxu0 %v157_v22  ;;  %502 = vmatpush.msrb.mxu1 %v225_v23  ;;  %v1140_v22 = vld [vmem:[#allocation2 + $0x18] sm:$0xff] }
  0x25   :  { %v353_v25 = vld [vmem:[#allocation7 + $0x7c0] sm:$0xff]  ;;  %526 = vmatpush.msrb.mxu2 %v285_v24  ;;  %899 = vmatmul.msk.f32.vlgmr.msra.gmra.mxu3 %vm379_vm0, %v361_v46  ;;  %v162_v23 = vld [vmem:[#allocation7 + $0x1c8] sm:$0xff] }
  0x26   :  { %v153_v26 = vld [vmem:[#allocation7 + $0x180] sm:$0xff]  ;;  %548 = vmatpush.msrb.mxu3 %v353_v25  ;;  %897 = vmatmul.msk.f32.vlgmr.msra.gmra.mxu2 %vm379_vm0, %v361_v46  ;;  %v230_v24 = vld [vmem:[#allocation7 + $0x3e8] sm:$0xff] }
  0x27   :  { %v221_v27 = vld [vmem:[#allocation7 + $0x3a0] sm:$0xff]  ;;  %481 = vmatpush.msrb.mxu0 %v153_v26  ;;  %895 = vmatmul.msk.f32.vlgmr.msra.gmra.mxu1 %vm379_vm0, %v361_v46  ;;  %v290_v25 = vld [vmem:[#allocation7 + $0x5c8] sm:$0xff] }
  0x28   :  { %v281_v28 = vld [vmem:[#allocation7 + $0x580] sm:$0xff]  ;;  %503 = vmatpush.msrb.mxu1 %v221_v27  ;;  %v358_v26 = vld [vmem:[#allocation7 + $0x7e8] sm:$0xff]  ;;  %v1143_v27 = vld [vmem:[#allocation2 + $0x8] sm:$0xff] }
  0x29   :  { %v349_v29 = vld [vmem:[#allocation7 + $0x7a0] sm:$0xff]  ;;  %527 = vmatpush.msrb.mxu2 %v281_v28  ;;  %v158_v28 = vld [vmem:[#allocation7 + $0x1a8] sm:$0xff] }
  0x2a   :  { %v149_v30 = vld [vmem:[#allocation7 + $0x160] sm:$0xff]  ;;  %549 = vmatpush.msrb.mxu3 %v349_v29  ;;  %v226_v29 = vld [vmem:[#allocation7 + $0x3c8] sm:$0xff] }
  0x2b   :  { %v217_v31 = vld [vmem:[#allocation7 + $0x380] sm:$0xff]  ;;  %482 = vmatpush.msrb.mxu0 %v149_v30  ;;  %v286_v30 = vld [vmem:[#allocation7 + $0x5a8] sm:$0xff] }
  0x2c   :  { %v277_v32 = vld [vmem:[#allocation7 + $0x560] sm:$0xff]  ;;  %504 = vmatpush.msrb.mxu1 %v217_v31  ;;  %894 = vmatmul.msk.f32.gmra.mxu0 %vm379_vm0, %v362_v63  ;;  %v354_v31 = vld [vmem:[#allocation7 + $0x7c8] sm:$0xff] }
  0x2d   :  { %v345_v33 = vld [vmem:[#allocation7 + $0x780] sm:$0xff]  ;;  %528 = vmatpush.msrb.mxu2 %v277_v32  ;;  %900 = vmatmul.msk.f32.gmra.mxu3 %vm379_vm0, %v362_v63  ;;  %v154_v32 = vld [vmem:[#allocation7 + $0x188] sm:$0xff] }
  0x2e   :  { %v145_v34 = vld [vmem:[#allocation7 + $0x140] sm:$0xff]  ;;  %550 = vmatpush.msrb.mxu3 %v345_v33  ;;  %898 = vmatmul.msk.f32.gmra.mxu2 %vm379_vm0, %v362_v63  ;;  %v222_v33 = vld [vmem:[#allocation7 + $0x3a8] sm:$0xff] }
  0x2f   :  { %v213_v35 = vld [vmem:[#allocation7 + $0x360] sm:$0xff]  ;;  %483 = vmatpush.msrb.mxu0 %v145_v34  ;;  %896 = vmatmul.msk.f32.gmra.mxu1 %vm379_vm0, %v362_v63  ;;  %v282_v34 = vld [vmem:[#allocation7 + $0x588] sm:$0xff] }
  0x30   :  { %v273_v36 = vld [vmem:[#allocation7 + $0x540] sm:$0xff]  ;;  %505 = vmatpush.msrb.mxu1 %v213_v35  ;;  %v350_v35 = vld [vmem:[#allocation7 + $0x7a8] sm:$0xff] }
  0x31   :  { %v341_v37 = vld [vmem:[#allocation7 + $0x760] sm:$0xff]  ;;  %529 = vmatpush.msrb.mxu2 %v273_v36  ;;  %v150_v36 = vld [vmem:[#allocation7 + $0x168] sm:$0xff] }
  0x32   :  { %v141_v38 = vld [vmem:[#allocation7 + $0x120] sm:$0xff]  ;;  %551 = vmatpush.msrb.mxu3 %v341_v37  ;;  %v218_v37 = vld [vmem:[#allocation7 + $0x388] sm:$0xff] }
  0x33   :  { %v209_v39 = vld [vmem:[#allocation7 + $0x340] sm:$0xff]  ;;  %484 = vmatpush.msrb.mxu0 %v141_v38  ;;  %v278_v38 = vld [vmem:[#allocation7 + $0x568] sm:$0xff] }
  0x34   :  { %v269_v40 = vld [vmem:[#allocation7 + $0x520] sm:$0xff]  ;;  %506 = vmatpush.msrb.mxu1 %v209_v39  ;;  %v346_v39 = vld [vmem:[#allocation7 + $0x788] sm:$0xff] }
  0x35   :  { %v337_v41 = vld [vmem:[#allocation7 + $0x740] sm:$0xff]  ;;  %530 = vmatpush.msrb.mxu2 %v269_v40  ;;  %v146_v40 = vld [vmem:[#allocation7 + $0x148] sm:$0xff] }
  0x36   :  { %v137_v42 = vld [vmem:[#allocation7 + $0x100] sm:$0xff]  ;;  %552 = vmatpush.msrb.mxu3 %v337_v41  ;;  %v214_v41 = vld [vmem:[#allocation7 + $0x368] sm:$0xff] }
  0x37   :  { %v205_v43 = vld [vmem:[#allocation7 + $0x320] sm:$0xff]  ;;  %485 = vmatpush.msrb.mxu0 %v137_v42  ;;  %v274_v42 = vld [vmem:[#allocation7 + $0x548] sm:$0xff] }
  0x38   :  { %v265_v44 = vld [vmem:[#allocation7 + $0x500] sm:$0xff]  ;;  %507 = vmatpush.msrb.mxu1 %v205_v43  ;;  %v342_v43 = vld [vmem:[#allocation7 + $0x768] sm:$0xff] }
  0x39   :  { %v333_v45 = vld [vmem:[#allocation7 + $0x720] sm:$0xff]  ;;  %531 = vmatpush.msrb.mxu2 %v265_v44  ;;  %v142_v44 = vld [vmem:[#allocation7 + $0x128] sm:$0xff] }
  0x3a   :  { %v133_v47 = vld [vmem:[#allocation7 + $0xe0] sm:$0xff]  ;;  %553 = vmatpush.msrb.mxu3 %v333_v45  ;;  %v210_v45 = vld [vmem:[#allocation7 + $0x348] sm:$0xff] }
  0x3b   :  { %v201_v48 = vld [vmem:[#allocation7 + $0x300] sm:$0xff]  ;;  %486 = vmatpush.msrb.mxu0 %v133_v47  ;;  %v270_v46 = vld [vmem:[#allocation7 + $0x528] sm:$0xff] }
  0x3c   :  { %v261_v49 = vld [vmem:[#allocation7 + $0x4e0] sm:$0xff]  ;;  %508 = vmatpush.msrb.mxu1 %v201_v48  ;;  %v338_v47 = vld [vmem:[#allocation7 + $0x748] sm:$0xff] }
  0x3d   :  { %v329_v50 = vld [vmem:[#allocation7 + $0x700] sm:$0xff]  ;;  %532 = vmatpush.msrb.mxu2 %v261_v49  ;;  %v138_v48 = vld [vmem:[#allocation7 + $0x108] sm:$0xff] }
  0x3e   :  { %v129_v51 = vld [vmem:[#allocation7 + $0xc0] sm:$0xff]  ;;  %554 = vmatpush.msrb.mxu3 %v329_v50  ;;  %v206_v49 = vld [vmem:[#allocation7 + $0x328] sm:$0xff] }
  0x3f   :  { %v197_v52 = vld [vmem:[#allocation7 + $0x2e0] sm:$0xff]  ;;  %487 = vmatpush.msrb.mxu0 %v129_v51  ;;  %v266_v50 = vld [vmem:[#allocation7 + $0x508] sm:$0xff] }
  0x40   :  { %v257_v53 = vld [vmem:[#allocation7 + $0x4c0] sm:$0xff]  ;;  %509 = vmatpush.msrb.mxu1 %v197_v52  ;;  %v334_v51 = vld [vmem:[#allocation7 + $0x728] sm:$0xff] }
  0x41   :  { %v325_v54 = vld [vmem:[#allocation7 + $0x6e0] sm:$0xff]  ;;  %533 = vmatpush.msrb.mxu2 %v257_v53  ;;  %v134_v52 = vld [vmem:[#allocation7 + $0xe8] sm:$0xff] }
  0x42   :  { %v125_v55 = vld [vmem:[#allocation7 + $0xa0] sm:$0xff]  ;;  %555 = vmatpush.msrb.mxu3 %v325_v54  ;;  %v202_v53 = vld [vmem:[#allocation7 + $0x308] sm:$0xff] }
  0x43   :  { %v193_v56 = vld [vmem:[#allocation7 + $0x2c0] sm:$0xff]  ;;  %488 = vmatpush.msrb.mxu0 %v125_v55  ;;  %v262_v54 = vld [vmem:[#allocation7 + $0x4e8] sm:$0xff] }
  0x44   :  { %v253_v57 = vld [vmem:[#allocation7 + $0x4a0] sm:$0xff]  ;;  %510 = vmatpush.msrb.mxu1 %v193_v56  ;;  %v330_v55 = vld [vmem:[#allocation7 + $0x708] sm:$0xff] }
  0x45   :  { %v321_v58 = vld [vmem:[#allocation7 + $0x6c0] sm:$0xff]  ;;  %534 = vmatpush.msrb.mxu2 %v253_v57  ;;  %v130_v56 = vld [vmem:[#allocation7 + $0xc8] sm:$0xff] }
  0x46   :  { %v121_v59 = vld [vmem:[#allocation7 + $0x80] sm:$0xff]  ;;  %556 = vmatpush.msrb.mxu3 %v321_v58  ;;  %v198_v57 = vld [vmem:[#allocation7 + $0x2e8] sm:$0xff] }
  0x47   :  { %v189_v60 = vld [vmem:[#allocation7 + $0x2a0] sm:$0xff]  ;;  %489 = vmatpush.msrb.mxu0 %v121_v59  ;;  %v258_v58 = vld [vmem:[#allocation7 + $0x4c8] sm:$0xff] }
  0x48   :  { %v249_v61 = vld [vmem:[#allocation7 + $0x480] sm:$0xff]  ;;  %511 = vmatpush.msrb.mxu1 %v189_v60  ;;  %v326_v59 = vld [vmem:[#allocation7 + $0x6e8] sm:$0xff] }
  0x49   :  { %v317_v62 = vld [vmem:[#allocation7 + $0x6a0] sm:$0xff]  ;;  %535 = vmatpush.msrb.mxu2 %v249_v61  ;;  %v126_v60 = vld [vmem:[#allocation7 + $0xa8] sm:$0xff] }
  0x4a   :  { %v117_v0 = vld [vmem:[#allocation7 + $0x60] sm:$0xff]  ;;  %557 = vmatpush.msrb.mxu3 %v317_v62  ;;  %v194_v61 = vld [vmem:[#allocation7 + $0x2c8] sm:$0xff] }
  0x4b   :  { %v185_v1 = vld [vmem:[#allocation7 + $0x280] sm:$0xff]  ;;  %490 = vmatpush.msrb.mxu0 %v117_v0  ;;  %v254_v62 = vld [vmem:[#allocation7 + $0x4a8] sm:$0xff] }
  0x4c   :  { %v245_v2 = vld [vmem:[#allocation7 + $0x460] sm:$0xff]  ;;  %512 = vmatpush.msrb.mxu1 %v185_v1  ;;  %v322_v63 = vld [vmem:[#allocation7 + $0x6c8] sm:$0xff] }
  0x4d   :  { %v313_v3 = vld [vmem:[#allocation7 + $0x680] sm:$0xff]  ;;  %536 = vmatpush.msrb.mxu2 %v245_v2  ;;  %v122_v0 = vld [vmem:[#allocation7 + $0x88] sm:$0xff] }
  0x4e   :  { %v113_v4 = vld [vmem:[#allocation7 + $0x40] sm:$0xff]  ;;  %558 = vmatpush.msrb.mxu3 %v313_v3  ;;  %v190_v1 = vld [vmem:[#allocation7 + $0x2a8] sm:$0xff] }
  0x4f   :  { %v181_v5 = vld [vmem:[#allocation7 + $0x260] sm:$0xff]  ;;  %491 = vmatpush.msrb.mxu0 %v113_v4  ;;  %v250_v2 = vld [vmem:[#allocation7 + $0x488] sm:$0xff]  ;;  %v1147_v4 = vld [vmem:[#allocation2 + $0x20] sm:$0xff] }
  0x50   :  { %v241_v6 = vld [vmem:[#allocation7 + $0x440] sm:$0xff]  ;;  %513 = vmatpush.msrb.mxu1 %v181_v5  ;;  %v318_v3 = vld [vmem:[#allocation7 + $0x6a8] sm:$0xff] }
  0x51   :  { %v309_v7 = vld [vmem:[#allocation7 + $0x660] sm:$0xff]  ;;  %537 = vmatpush.msrb.mxu2 %v241_v6  ;;  %v118_v6 = vld [vmem:[#allocation7 + $0x68] sm:$0xff] }
  0x52   :  { %v109_v8 = vld [vmem:[#allocation7 + $0x20] sm:$0xff]  ;;  %559 = vmatpush.msrb.mxu3 %v309_v7  ;;  %v186_v7 = vld [vmem:[#allocation7 + $0x288] sm:$0xff] }
  0x53   :  { %v177_v9 = vld [vmem:[#allocation7 + $0x240] sm:$0xff]  ;;  %492 = vmatpush.msrb.mxu0 %v109_v8  ;;  %v246_v8 = vld [vmem:[#allocation7 + $0x468] sm:$0xff] }
  0x54   :  { %v237_v10 = vld [vmem:[#allocation7 + $0x420] sm:$0xff]  ;;  %514 = vmatpush.msrb.mxu1 %v177_v9  ;;  %v314_v9 = vld [vmem:[#allocation7 + $0x688] sm:$0xff] }
  0x55   :  { %v305_v11 = vld [vmem:[#allocation7 + $0x640] sm:$0xff]  ;;  %538 = vmatpush.msrb.mxu2 %v237_v10  ;;  %v1153_v10 = vld [vmem:[#allocation2 + $0x28] sm:$0xff] }
  0x56   :  { %v105_v12 = vld [vmem:[#allocation7] sm:$0xff]  ;;  %560 = vmatpush.msrb.mxu3 %v305_v11  ;;  %v1155_v11 = vld [vmem:[#allocation2 + $0x38] sm:$0xff] }
  0x57   :  { %v173_v13 = vld [vmem:[#allocation7 + $0x220] sm:$0xff]  ;;  %493 = vmatpush.msrb.mxu0 %v105_v12  ;;  %v114_v12 = vld [vmem:[#allocation7 + $0x48] sm:$0xff] }
  0x58   :  { %v233_v14 = vld [vmem:[#allocation7 + $0x400] sm:$0xff]  ;;  %515 = vmatpush.msrb.mxu1 %v173_v13  ;;  %494 = vmatmul.f32.vlgmr.msrb.gmra.mxu0 %v1137_v21  ;;  %v182_v13 = vld [vmem:[#allocation7 + $0x268] sm:$0xff] }
  0x59   :  { %v301_v15 = vld [vmem:[#allocation7 + $0x620] sm:$0xff]  ;;  %539 = vmatpush.msrb.mxu2 %v233_v14  ;;  %570 = vmatpush.msra.mxu0 %v166_v17  ;;  %v242_v14 = vld [vmem:[#allocation7 + $0x448] sm:$0xff] }
  0x5a   :  { %v1135_v16 = vld [vmem:[#allocation2 + $0x10] sm:$0xff]  ;;  %561 = vmatpush.msrb.mxu3 %v301_v15  ;;  %v310_v15 = vld [vmem:[#allocation7 + $0x668] sm:$0xff] }
  0x5b   :  { %v169_v19 = vld [vmem:[#allocation7 + $0x200] sm:$0xff]  ;;  %540 = vmatmul.f32.vlgmr.msrb.gmra.mxu2 %v1135_v16  ;;  %571 = vmatpush.msra.mxu0 %v162_v23  ;;  %v110_v17 = vld [vmem:[#allocation7 + $0x28] sm:$0xff] }
  0x5c   :  { %v297_v20 = vld [vmem:[#allocation7 + $0x600] sm:$0xff]  ;;  %616 = vmatpush.msra.mxu2 %v294_v18  ;;  %516 = vmatpush.msrb.mxu1 %v169_v19  ;;  %v178_v18 = vld [vmem:[#allocation7 + $0x248] sm:$0xff] }
  0x5d   :  { %562 = vmatpush.msrb.mxu3 %v297_v20  ;;  %517 = vmatmul.f32.vlgmr.msrb.gmra.mxu1 %v1143_v27  ;;  %v1149_v5 = vld [vmem:[#allocation2 + $0x30] sm:$0xff]  ;;  %v238_v19 = vld [vmem:[#allocation7 + $0x428] sm:$0xff] }
  0x5e   :  { %563 = vmatmul.f32.vlgmr.msrb.gmra.mxu3 %v1140_v22  ;;  %593 = vmatpush.msra.mxu1 %v230_v24  ;;  %v306_v20 = vld [vmem:[#allocation7 + $0x648] sm:$0xff] }
  0x5f   :  { %617 = vmatpush.msra.mxu2 %v290_v25  ;;  %639 = vmatpush.msra.mxu3 %v358_v26  ;;  %v106_v23 = vld [vmem:[#allocation7 + $0x8] sm:$0xff] }
  0x60   :  { %572 = vmatpush.msra.mxu0 %v158_v28  ;;  %594 = vmatpush.msra.mxu1 %v226_v29  ;;  %v174_v24 = vld [vmem:[#allocation7 + $0x228] sm:$0xff]  ;;  %v167_v28 = vld [vmem:[#allocation7 + $0x1f0] sm:$0xff] }
  0x61   :  { %618 = vmatpush.msra.mxu2 %v286_v30  ;;  %640 = vmatpush.msra.mxu3 %v354_v31  ;;  %v234_v25 = vld [vmem:[#allocation7 + $0x408] sm:$0xff]  ;;  %v295_v29 = vld [vmem:[#allocation7 + $0x5f0] sm:$0xff] }
  0x62   :  { %573 = vmatpush.msra.mxu0 %v154_v32  ;;  %595 = vmatpush.msra.mxu1 %v222_v33  ;;  %v302_v26 = vld [vmem:[#allocation7 + $0x628] sm:$0xff]  ;;  %v163_v32 = vld [vmem:[#allocation7 + $0x1d0] sm:$0xff] }
  0x63   :  { %619 = vmatpush.msra.mxu2 %v282_v34  ;;  %641 = vmatpush.msra.mxu3 %v350_v35  ;;  %v170_v30 = vld [vmem:[#allocation7 + $0x208] sm:$0xff]  ;;  %v231_v33 = vld [vmem:[#allocation7 + $0x3f0] sm:$0xff] }
  0x64   :  { %574 = vmatpush.msra.mxu0 %v150_v36  ;;  %596 = vmatpush.msra.mxu1 %v218_v37  ;;  %v298_v31 = vld [vmem:[#allocation7 + $0x608] sm:$0xff]  ;;  %v291_v34 = vld [vmem:[#allocation7 + $0x5d0] sm:$0xff] }
  0x65   :  { %620 = vmatpush.msra.mxu2 %v278_v38  ;;  %642 = vmatpush.msra.mxu3 %v346_v39  ;;  %v359_v35 = vld [vmem:[#allocation7 + $0x7f0] sm:$0xff] }
  0x66   :  { %575 = vmatpush.msra.mxu0 %v146_v40  ;;  %597 = vmatpush.msra.mxu1 %v214_v41  ;;  %v159_v36 = vld [vmem:[#allocation7 + $0x1b0] sm:$0xff] }
  0x67   :  { %621 = vmatpush.msra.mxu2 %v274_v42  ;;  %643 = vmatpush.msra.mxu3 %v342_v43  ;;  %v227_v37 = vld [vmem:[#allocation7 + $0x3d0] sm:$0xff] }
  0x68   :  { %576 = vmatpush.msra.mxu0 %v142_v44  ;;  %598 = vmatpush.msra.mxu1 %v210_v45  ;;  %v287_v38 = vld [vmem:[#allocation7 + $0x5b0] sm:$0xff] }
  0x69   :  { %622 = vmatpush.msra.mxu2 %v270_v46  ;;  %644 = vmatpush.msra.mxu3 %v338_v47  ;;  %v355_v39 = vld [vmem:[#allocation7 + $0x7d0] sm:$0xff] }
  0x6a   :  { %577 = vmatpush.msra.mxu0 %v138_v48  ;;  %599 = vmatpush.msra.mxu1 %v206_v49  ;;  %v155_v40 = vld [vmem:[#allocation7 + $0x190] sm:$0xff] }
  0x6b   :  { %623 = vmatpush.msra.mxu2 %v266_v50  ;;  %645 = vmatpush.msra.mxu3 %v334_v51  ;;  %v223_v41 = vld [vmem:[#allocation7 + $0x3b0] sm:$0xff] }
  0x6c   :  { %578 = vmatpush.msra.mxu0 %v134_v52  ;;  %600 = vmatpush.msra.mxu1 %v202_v53  ;;  %v283_v42 = vld [vmem:[#allocation7 + $0x590] sm:$0xff] }
  0x6d   :  { %624 = vmatpush.msra.mxu2 %v262_v54  ;;  %646 = vmatpush.msra.mxu3 %v330_v55  ;;  %v351_v43 = vld [vmem:[#allocation7 + $0x7b0] sm:$0xff] }
  0x6e   :  { %579 = vmatpush.msra.mxu0 %v130_v56  ;;  %601 = vmatpush.msra.mxu1 %v198_v57  ;;  %v151_v44 = vld [vmem:[#allocation7 + $0x170] sm:$0xff] }
  0x6f   :  { %625 = vmatpush.msra.mxu2 %v258_v58  ;;  %647 = vmatpush.msra.mxu3 %v326_v59  ;;  %v219_v45 = vld [vmem:[#allocation7 + $0x390] sm:$0xff] }
  0x70   :  { %580 = vmatpush.msra.mxu0 %v126_v60  ;;  %602 = vmatpush.msra.mxu1 %v194_v61  ;;  %v279_v46 = vld [vmem:[#allocation7 + $0x570] sm:$0xff] }
  0x71   :  { %626 = vmatpush.msra.mxu2 %v254_v62  ;;  %648 = vmatpush.msra.mxu3 %v322_v63  ;;  %v347_v47 = vld [vmem:[#allocation7 + $0x790] sm:$0xff] }
  0x72   :  { %581 = vmatpush.msra.mxu0 %v122_v0  ;;  %603 = vmatpush.msra.mxu1 %v190_v1  ;;  %v147_v48 = vld [vmem:[#allocation7 + $0x150] sm:$0xff] }
  0x73   :  { %627 = vmatpush.msra.mxu2 %v250_v2  ;;  %649 = vmatpush.msra.mxu3 %v318_v3  ;;  %v215_v49 = vld [vmem:[#allocation7 + $0x370] sm:$0xff] }
  0x74   :  { %497 = vmatmul.f32.gmra.mxu0 %v1147_v4  ;;  %543 = vmatmul.f32.gmra.mxu2 %v1149_v5  ;;  %v275_v50 = vld [vmem:[#allocation7 + $0x550] sm:$0xff] }
  0x75   :  { %582 = vmatpush.msra.mxu0 %v118_v6  ;;  %604 = vmatpush.msra.mxu1 %v186_v7  ;;  %v343_v51 = vld [vmem:[#allocation7 + $0x770] sm:$0xff] }
  0x76   :  { %628 = vmatpush.msra.mxu2 %v246_v8  ;;  %650 = vmatpush.msra.mxu3 %v314_v9  ;;  %v143_v52 = vld [vmem:[#allocation7 + $0x130] sm:$0xff] }
  0x77   :  { %520 = vmatmul.f32.gmra.mxu1 %v1153_v10  ;;  %566 = vmatmul.f32.gmra.mxu3 %v1155_v11  ;;  %v211_v53 = vld [vmem:[#allocation7 + $0x350] sm:$0xff] }
  0x78   :  { %583 = vmatpush.msra.mxu0 %v114_v12  ;;  %605 = vmatpush.msra.mxu1 %v182_v13  ;;  %v271_v54 = vld [vmem:[#allocation7 + $0x530] sm:$0xff] }
  0x79   :  { %629 = vmatpush.msra.mxu2 %v242_v14  ;;  %651 = vmatpush.msra.mxu3 %v310_v15  ;;  %v339_v55 = vld [vmem:[#allocation7 + $0x750] sm:$0xff] }
  0x7a   :  { %584 = vmatpush.msra.mxu0 %v110_v17  ;;  %606 = vmatpush.msra.mxu1 %v178_v18  ;;  %v139_v56 = vld [vmem:[#allocation7 + $0x110] sm:$0xff] }
  0x7b   :  { %630 = vmatpush.msra.mxu2 %v238_v19  ;;  %652 = vmatpush.msra.mxu3 %v306_v20  ;;  %v207_v57 = vld [vmem:[#allocation7 + $0x330] sm:$0xff] }
  0x7c   :  { %585 = vmatpush.msra.mxu0 %v106_v23  ;;  %607 = vmatpush.msra.mxu1 %v174_v24  ;;  %v267_v58 = vld [vmem:[#allocation7 + $0x510] sm:$0xff] }
  0x7d   :  { %631 = vmatpush.msra.mxu2 %v234_v25  ;;  %653 = vmatpush.msra.mxu3 %v302_v26  ;;  %v335_v59 = vld [vmem:[#allocation7 + $0x730] sm:$0xff] }
  0x7e   :  { %586 = vmatmul.f32.vlgmr.msra.gmra.mxu0 %v1137_v21  ;;  %632 = vmatmul.f32.vlgmr.msra.gmra.mxu2 %v1135_v16  ;;  %v135_v60 = vld [vmem:[#allocation7 + $0xf0] sm:$0xff] }
  0x7f   :  { %662 = vmatpush.msrb.mxu0 %v167_v28  ;;  %708 = vmatpush.msrb.mxu2 %v295_v29  ;;  %v203_v61 = vld [vmem:[#allocation7 + $0x310] sm:$0xff] }
  0x80   :  { %608 = vmatpush.msra.mxu1 %v170_v30  ;;  %654 = vmatpush.msra.mxu3 %v298_v31  ;;  %v263_v62 = vld [vmem:[#allocation7 + $0x4f0] sm:$0xff] }
  0x81   :  { %609 = vmatmul.f32.vlgmr.msra.gmra.mxu1 %v1143_v27  ;;  %655 = vmatmul.f32.vlgmr.msra.gmra.mxu3 %v1140_v22  ;;  %v331_v63 = vld [vmem:[#allocation7 + $0x710] sm:$0xff] }
  0x82   :  { %663 = vmatpush.msrb.mxu0 %v163_v32  ;;  %685 = vmatpush.msrb.mxu1 %v231_v33  ;;  %v131_v0 = vld [vmem:[#allocation7 + $0xd0] sm:$0xff] }
  0x83   :  { %709 = vmatpush.msrb.mxu2 %v291_v34  ;;  %731 = vmatpush.msrb.mxu3 %v359_v35  ;;  %v199_v1 = vld [vmem:[#allocation7 + $0x2f0] sm:$0xff] }
  0x84   :  { %664 = vmatpush.msrb.mxu0 %v159_v36  ;;  %686 = vmatpush.msrb.mxu1 %v227_v37  ;;  %v259_v2 = vld [vmem:[#allocation7 + $0x4d0] sm:$0xff]  ;;  %v168_v36 = vld [vmem:[#allocation7 + $0x1f8] sm:$0xff] }
  0x85   :  { %710 = vmatpush.msrb.mxu2 %v287_v38  ;;  %732 = vmatpush.msrb.mxu3 %v355_v39  ;;  %v327_v3 = vld [vmem:[#allocation7 + $0x6f0] sm:$0xff]  ;;  %v296_v37 = vld [vmem:[#allocation7 + $0x5f8] sm:$0xff] }
  0x86   :  { %665 = vmatpush.msrb.mxu0 %v155_v40  ;;  %687 = vmatpush.msrb.mxu1 %v223_v41  ;;  %v127_v6 = vld [vmem:[#allocation7 + $0xb0] sm:$0xff]  ;;  %v164_v40 = vld [vmem:[#allocation7 + $0x1d8] sm:$0xff] }
  0x87   :  { %711 = vmatpush.msrb.mxu2 %v283_v42  ;;  %733 = vmatpush.msrb.mxu3 %v351_v43  ;;  %v195_v7 = vld [vmem:[#allocation7 + $0x2d0] sm:$0xff]  ;;  %v232_v41 = vld [vmem:[#allocation7 + $0x3f8] sm:$0xff] }
  0x88   :  { %589 = vmatmul.f32.gmra.mxu0 %v1147_v4  ;;  %635 = vmatmul.f32.gmra.mxu2 %v1149_v5  ;;  %v255_v8 = vld [vmem:[#allocation7 + $0x4b0] sm:$0xff]  ;;  %v292_v42 = vld [vmem:[#allocation7 + $0x5d8] sm:$0xff] }
  0x89   :  { %666 = vmatpush.msrb.mxu0 %v151_v44  ;;  %688 = vmatpush.msrb.mxu1 %v219_v45  ;;  %v323_v9 = vld [vmem:[#allocation7 + $0x6d0] sm:$0xff]  ;;  %v360_v43 = vld [vmem:[#allocation7 + $0x7f8] sm:$0xff] }
  0x8a   :  { %712 = vmatpush.msrb.mxu2 %v279_v46  ;;  %734 = vmatpush.msrb.mxu3 %v347_v47  ;;  %v123_v12 = vld [vmem:[#allocation7 + $0x90] sm:$0xff]  ;;  %v160_v44 = vld [vmem:[#allocation7 + $0x1b8] sm:$0xff] }
  0x8b   :  { %612 = vmatmul.f32.gmra.mxu1 %v1153_v10  ;;  %658 = vmatmul.f32.gmra.mxu3 %v1155_v11  ;;  %v191_v13 = vld [vmem:[#allocation7 + $0x2b0] sm:$0xff]  ;;  %v228_v45 = vld [vmem:[#allocation7 + $0x3d8] sm:$0xff] }
  0x8c   :  { %667 = vmatpush.msrb.mxu0 %v147_v48  ;;  %689 = vmatpush.msrb.mxu1 %v215_v49  ;;  %v251_v14 = vld [vmem:[#allocation7 + $0x490] sm:$0xff]  ;;  %v288_v46 = vld [vmem:[#allocation7 + $0x5b8] sm:$0xff] }
  0x8d   :  { %713 = vmatpush.msrb.mxu2 %v275_v50  ;;  %735 = vmatpush.msrb.mxu3 %v343_v51  ;;  %v319_v15 = vld [vmem:[#allocation7 + $0x6b0] sm:$0xff]  ;;  %v356_v47 = vld [vmem:[#allocation7 + $0x7d8] sm:$0xff] }
  0x8e   :  { %668 = vmatpush.msrb.mxu0 %v143_v52  ;;  %690 = vmatpush.msrb.mxu1 %v211_v53  ;;  %v119_v17 = vld [vmem:[#allocation7 + $0x70] sm:$0xff]  ;;  %v156_v48 = vld [vmem:[#allocation7 + $0x198] sm:$0xff] }
  0x8f   :  { %714 = vmatpush.msrb.mxu2 %v271_v54  ;;  %736 = vmatpush.msrb.mxu3 %v339_v55  ;;  %v187_v18 = vld [vmem:[#allocation7 + $0x290] sm:$0xff]  ;;  %v224_v49 = vld [vmem:[#allocation7 + $0x3b8] sm:$0xff] }
  0x90   :  { %669 = vmatpush.msrb.mxu0 %v139_v56  ;;  %691 = vmatpush.msrb.mxu1 %v207_v57  ;;  %v247_v19 = vld [vmem:[#allocation7 + $0x470] sm:$0xff]  ;;  %v284_v50 = vld [vmem:[#allocation7 + $0x598] sm:$0xff] }
  0x91   :  { %715 = vmatpush.msrb.mxu2 %v267_v58  ;;  %737 = vmatpush.msrb.mxu3 %v335_v59  ;;  %v315_v20 = vld [vmem:[#allocation7 + $0x690] sm:$0xff]  ;;  %v352_v51 = vld [vmem:[#allocation7 + $0x7b8] sm:$0xff] }
  0x92   :  { %670 = vmatpush.msrb.mxu0 %v135_v60  ;;  %692 = vmatpush.msrb.mxu1 %v203_v61  ;;  %v115_v23 = vld [vmem:[#allocation7 + $0x50] sm:$0xff]  ;;  %v152_v52 = vld [vmem:[#allocation7 + $0x178] sm:$0xff] }
  0x93   :  { %716 = vmatpush.msrb.mxu2 %v263_v62  ;;  %738 = vmatpush.msrb.mxu3 %v331_v63  ;;  %v183_v24 = vld [vmem:[#allocation7 + $0x270] sm:$0xff]  ;;  %v220_v53 = vld [vmem:[#allocation7 + $0x398] sm:$0xff] }
  0x94   :  { %671 = vmatpush.msrb.mxu0 %v131_v0  ;;  %693 = vmatpush.msrb.mxu1 %v199_v1  ;;  %v243_v25 = vld [vmem:[#allocation7 + $0x450] sm:$0xff]  ;;  %v280_v54 = vld [vmem:[#allocation7 + $0x578] sm:$0xff] }
  0x95   :  { %717 = vmatpush.msrb.mxu2 %v259_v2  ;;  %739 = vmatpush.msrb.mxu3 %v327_v3  ;;  %v311_v26 = vld [vmem:[#allocation7 + $0x670] sm:$0xff]  ;;  %v348_v55 = vld [vmem:[#allocation7 + $0x798] sm:$0xff] }
  0x96   :  { %672 = vmatpush.msrb.mxu0 %v127_v6  ;;  %694 = vmatpush.msrb.mxu1 %v195_v7  ;;  %v111_v28 = vld [vmem:[#allocation7 + $0x30] sm:$0xff]  ;;  %v148_v56 = vld [vmem:[#allocation7 + $0x158] sm:$0xff] }
  0x97   :  { %718 = vmatpush.msrb.mxu2 %v255_v8  ;;  %740 = vmatpush.msrb.mxu3 %v323_v9  ;;  %v179_v29 = vld [vmem:[#allocation7 + $0x250] sm:$0xff]  ;;  %v216_v57 = vld [vmem:[#allocation7 + $0x378] sm:$0xff] }
  0x98   :  { %673 = vmatpush.msrb.mxu0 %v123_v12  ;;  %695 = vmatpush.msrb.mxu1 %v191_v13  ;;  %v239_v30 = vld [vmem:[#allocation7 + $0x430] sm:$0xff]  ;;  %v276_v58 = vld [vmem:[#allocation7 + $0x558] sm:$0xff] }
  0x99   :  { %719 = vmatpush.msrb.mxu2 %v251_v14  ;;  %741 = vmatpush.msrb.mxu3 %v319_v15  ;;  %v307_v31 = vld [vmem:[#allocation7 + $0x650] sm:$0xff]  ;;  %v344_v59 = vld [vmem:[#allocation7 + $0x778] sm:$0xff] }
  0x9a   :  { %674 = vmatpush.msrb.mxu0 %v119_v17  ;;  %696 = vmatpush.msrb.mxu1 %v187_v18  ;;  %v107_v32 = vld [vmem:[#allocation7 + $0x10] sm:$0xff]  ;;  %v144_v60 = vld [vmem:[#allocation7 + $0x138] sm:$0xff] }
  0x9b   :  { %720 = vmatpush.msrb.mxu2 %v247_v19  ;;  %742 = vmatpush.msrb.mxu3 %v315_v20  ;;  %v175_v33 = vld [vmem:[#allocation7 + $0x230] sm:$0xff]  ;;  %v212_v61 = vld [vmem:[#allocation7 + $0x358] sm:$0xff] }
  0x9c   :  { %675 = vmatpush.msrb.mxu0 %v115_v23  ;;  %697 = vmatpush.msrb.mxu1 %v183_v24  ;;  %v235_v34 = vld [vmem:[#allocation7 + $0x410] sm:$0xff]  ;;  %v272_v62 = vld [vmem:[#allocation7 + $0x538] sm:$0xff] }
  0x9d   :  { %721 = vmatpush.msrb.mxu2 %v243_v25  ;;  %743 = vmatpush.msrb.mxu3 %v311_v26  ;;  %v303_v35 = vld [vmem:[#allocation7 + $0x630] sm:$0xff]  ;;  %v340_v63 = vld [vmem:[#allocation7 + $0x758] sm:$0xff] }
  0x9e   :  { %676 = vmatpush.msrb.mxu0 %v111_v28  ;;  %698 = vmatpush.msrb.mxu1 %v179_v29  ;;  %v171_v38 = vld [vmem:[#allocation7 + $0x210] sm:$0xff]  ;;  %v140_v0 = vld [vmem:[#allocation7 + $0x118] sm:$0xff] }
  0x9f   :  { %722 = vmatpush.msrb.mxu2 %v239_v30  ;;  %744 = vmatpush.msrb.mxu3 %v307_v31  ;;  %v299_v39 = vld [vmem:[#allocation7 + $0x610] sm:$0xff]  ;;  %v208_v1 = vld [vmem:[#allocation7 + $0x338] sm:$0xff] }
  0xa0   :  { %677 = vmatpush.msrb.mxu0 %v107_v32  ;;  %699 = vmatpush.msrb.mxu1 %v175_v33  ;;  %v268_v2 = vld [vmem:[#allocation7 + $0x518] sm:$0xff] }
  0xa1   :  { %723 = vmatpush.msrb.mxu2 %v235_v34  ;;  %745 = vmatpush.msrb.mxu3 %v303_v35  ;;  %v336_v3 = vld [vmem:[#allocation7 + $0x738] sm:$0xff] }
  0xa2   :  { %678 = vmatmul.f32.vlgmr.msrb.gmra.mxu0 %v1137_v21  ;;  %724 = vmatmul.f32.vlgmr.msrb.gmra.mxu2 %v1135_v16  ;;  %v136_v6 = vld [vmem:[#allocation7 + $0xf8] sm:$0xff] }
  0xa3   :  { %754 = vmatpush.msra.mxu0 %v168_v36  ;;  %800 = vmatpush.msra.mxu2 %v296_v37  ;;  %v204_v7 = vld [vmem:[#allocation7 + $0x318] sm:$0xff] }
  0xa4   :  { %700 = vmatpush.msrb.mxu1 %v171_v38  ;;  %746 = vmatpush.msrb.mxu3 %v299_v39  ;;  %v264_v8 = vld [vmem:[#allocation7 + $0x4f8] sm:$0xff] }
  0xa5   :  { %701 = vmatmul.f32.vlgmr.msrb.gmra.mxu1 %v1143_v27  ;;  %747 = vmatmul.f32.vlgmr.msrb.gmra.mxu3 %v1140_v22  ;;  %v332_v9 = vld [vmem:[#allocation7 + $0x718] sm:$0xff] }
  0xa6   :  { %755 = vmatpush.msra.mxu0 %v164_v40  ;;  %777 = vmatpush.msra.mxu1 %v232_v41  ;;  %v132_v12 = vld [vmem:[#allocation7 + $0xd8] sm:$0xff] }
  0xa7   :  { %801 = vmatpush.msra.mxu2 %v292_v42  ;;  %823 = vmatpush.msra.mxu3 %v360_v43  ;;  %v200_v13 = vld [vmem:[#allocation7 + $0x2f8] sm:$0xff] }
  0xa8   :  { %756 = vmatpush.msra.mxu0 %v160_v44  ;;  %778 = vmatpush.msra.mxu1 %v228_v45  ;;  %v260_v14 = vld [vmem:[#allocation7 + $0x4d8] sm:$0xff] }
  0xa9   :  { %802 = vmatpush.msra.mxu2 %v288_v46  ;;  %824 = vmatpush.msra.mxu3 %v356_v47  ;;  %v328_v15 = vld [vmem:[#allocation7 + $0x6f8] sm:$0xff]  ;;  %v403_v46 = vpop.f32.mrf.mxu0  ;;  %v426_v47 = vpop.f32.mrf.mxu1 }
  0xaa   :  { %757 = vmatpush.msra.mxu0 %v156_v48  ;;  %779 = vmatpush.msra.mxu1 %v224_v49  ;;  %v128_v17 = vld [vmem:[#allocation7 + $0xb8] sm:$0xff]  ;;  %v449_v48 = vpop.f32.mrf.mxu2  ;;  %v1179_v49 = vpop.f32.mrf.mxu3 }
  0xab   :  { %803 = vmatpush.msra.mxu2 %v284_v50  ;;  %825 = vmatpush.msra.mxu3 %v352_v51  ;;  %v196_v18 = vld [vmem:[#allocation7 + $0x2d8] sm:$0xff] }
  0xac   :  { %681 = vmatmul.f32.gmra.mxu0 %v1147_v4  ;;  %727 = vmatmul.f32.gmra.mxu2 %v1149_v5  ;;  %v256_v19 = vld [vmem:[#allocation7 + $0x4b8] sm:$0xff] }
  0xad   :  { %758 = vmatpush.msra.mxu0 %v152_v52  ;;  %780 = vmatpush.msra.mxu1 %v220_v53  ;;  %v324_v20 = vld [vmem:[#allocation7 + $0x6d8] sm:$0xff]  ;;  %v1187_v53 = vld [vmem:[#allocation10] sm:$0xf] }
  0xae   :  { %804 = vmatpush.msra.mxu2 %v280_v54  ;;  %826 = vmatpush.msra.mxu3 %v348_v55  ;;  %v124_v23 = vld [vmem:[#allocation7 + $0x98] sm:$0xff] }
  0xaf   :  { %704 = vmatmul.f32.gmra.mxu1 %v1153_v10  ;;  %750 = vmatmul.f32.gmra.mxu3 %v1155_v11  ;;  %v192_v24 = vld [vmem:[#allocation7 + $0x2b8] sm:$0xff] }
  0xb0   :  { %759 = vmatpush.msra.mxu0 %v148_v56  ;;  %781 = vmatpush.msra.mxu1 %v216_v57  ;;  %v252_v25 = vld [vmem:[#allocation7 + $0x498] sm:$0xff] }
  0xb1   :  { %805 = vmatpush.msra.mxu2 %v276_v58  ;;  %827 = vmatpush.msra.mxu3 %v344_v59  ;;  %v320_v26 = vld [vmem:[#allocation7 + $0x6b8] sm:$0xff]  ;;  %v406_v50 = vpop.f32.mrf.mxu0 }
  0xb2   :  { %760 = vmatpush.msra.mxu0 %v144_v60  ;;  %782 = vmatpush.msra.mxu1 %v212_v61  ;;  %v120_v28 = vld [vmem:[#allocation7 + $0x78] sm:$0xff]  ;;  %v1185_v51 = vpop.f32.mrf.mxu3 }
  0xb3   :  { %806 = vmatpush.msra.mxu2 %v272_v62  ;;  %828 = vmatpush.msra.mxu3 %v340_v63  ;;  %v188_v29 = vld [vmem:[#allocation7 + $0x298] sm:$0xff] }
  0xb4   :  { %761 = vmatpush.msra.mxu0 %v140_v0  ;;  %783 = vmatpush.msra.mxu1 %v208_v1  ;;  %v248_v30 = vld [vmem:[#allocation7 + $0x478] sm:$0xff] }
  0xb5   :  { %807 = vmatpush.msra.mxu2 %v268_v2  ;;  %829 = vmatpush.msra.mxu3 %v336_v3  ;;  %v316_v31 = vld [vmem:[#allocation7 + $0x698] sm:$0xff] }
  0xb6   :  { %762 = vmatpush.msra.mxu0 %v136_v6  ;;  %784 = vmatpush.msra.mxu1 %v204_v7  ;;  %v116_v32 = vld [vmem:[#allocation7 + $0x58] sm:$0xff] }
  0xb7   :  { %808 = vmatpush.msra.mxu2 %v264_v8  ;;  %830 = vmatpush.msra.mxu3 %v332_v9  ;;  %v184_v33 = vld [vmem:[#allocation7 + $0x278] sm:$0xff] }
  0xb8   :  { %763 = vmatpush.msra.mxu0 %v132_v12  ;;  %785 = vmatpush.msra.mxu1 %v200_v13  ;;  %v244_v34 = vld [vmem:[#allocation7 + $0x458] sm:$0xff]  ;;  %v849_v12 = vperm.slane %v1187_v53, 1 }
  0xb9   :  { %809 = vmatpush.msra.mxu2 %v260_v14  ;;  %831 = vmatpush.msra.mxu3 %v328_v15  ;;  %v312_v35 = vld [vmem:[#allocation7 + $0x678] sm:$0xff] }
  0xba   :  { %764 = vmatpush.msra.mxu0 %v128_v17  ;;  %786 = vmatpush.msra.mxu1 %v196_v18  ;;  %v112_v36 = vld [vmem:[#allocation7 + $0x38] sm:$0xff] }
  0xbb   :  { %810 = vmatpush.msra.mxu2 %v256_v19  ;;  %832 = vmatpush.msra.mxu3 %v324_v20  ;;  %v180_v37 = vld [vmem:[#allocation7 + $0x258] sm:$0xff] }
  0xbc   :  { %765 = vmatpush.msra.mxu0 %v124_v23  ;;  %787 = vmatpush.msra.mxu1 %v192_v24  ;;  %v240_v38 = vld [vmem:[#allocation7 + $0x438] sm:$0xff] }
  0xbd   :  { %811 = vmatpush.msra.mxu2 %v252_v25  ;;  %833 = vmatpush.msra.mxu3 %v320_v26  ;;  %v308_v39 = vld [vmem:[#allocation7 + $0x658] sm:$0xff] }
  0xbe   :  { %766 = vmatpush.msra.mxu0 %v120_v28  ;;  %788 = vmatpush.msra.mxu1 %v188_v29  ;;  %v108_v40 = vld [vmem:[#allocation7 + $0x18] sm:$0xff] }
  0xbf   :  { %812 = vmatpush.msra.mxu2 %v248_v30  ;;  %834 = vmatpush.msra.mxu3 %v316_v31  ;;  %v176_v41 = vld [vmem:[#allocation7 + $0x238] sm:$0xff] }
  0xc0   :  { %767 = vmatpush.msra.mxu0 %v116_v32  ;;  %789 = vmatpush.msra.mxu1 %v184_v33  ;;  %v236_v42 = vld [vmem:[#allocation7 + $0x418] sm:$0xff] }
  0xc1   :  { %813 = vmatpush.msra.mxu2 %v244_v34  ;;  %835 = vmatpush.msra.mxu3 %v312_v35  ;;  %v304_v43 = vld [vmem:[#allocation7 + $0x638] sm:$0xff]  ;;  %v850_v35 = vperm.slane %v1187_v53, 2 }
  0xc2   :  { %768 = vmatpush.msra.mxu0 %v112_v36  ;;  %790 = vmatpush.msra.mxu1 %v180_v37  ;;  %v172_v44 = vld [vmem:[#allocation7 + $0x218] sm:$0xff] }
  0xc3   :  { %814 = vmatpush.msra.mxu2 %v240_v38  ;;  %836 = vmatpush.msra.mxu3 %v308_v39  ;;  %v300_v45 = vld [vmem:[#allocation7 + $0x618] sm:$0xff] }
  0xc4   :  { %769 = vmatpush.msra.mxu0 %v108_v40  ;;  %791 = vmatpush.msra.mxu1 %v176_v41 }
  0xc5   :  { %815 = vmatpush.msra.mxu2 %v236_v42  ;;  %837 = vmatpush.msra.mxu3 %v304_v43 }
  0xc6   :  { %770 = vmatmul.f32.vlgmr.msra.gmra.mxu0 %v1137_v21  ;;  %816 = vmatmul.f32.vlgmr.msra.gmra.mxu2 %v1135_v16  ;;  %v429_v16 = vpop.f32.mrf.mxu1  ;;  %v452_v21 = vpop.f32.mrf.mxu2 }
  0xc7   :  { %792 = vmatpush.msra.mxu1 %v172_v44  ;;  %838 = vmatpush.msra.mxu3 %v300_v45 }
  0xc8   :  { %793 = vmatmul.f32.vlgmr.msra.gmra.mxu1 %v1143_v27  ;;  %839 = vmatmul.f32.vlgmr.msra.gmra.mxu3 %v1140_v22 }
  0xce   :  { %773 = vmatmul.f32.gmra.mxu0 %v1147_v4  ;;  %819 = vmatmul.f32.gmra.mxu2 %v1149_v5  ;;  %v848_v4 = vperm.slane %v1187_v53, 0 }
  0xd0   :  { %796 = vmatmul.f32.gmra.mxu1 %v1153_v10  ;;  %842 = vmatmul.f32.gmra.mxu3 %v1155_v11 }
  0xd5   :  { %v495_v27 = vpop.f32.mrf.mxu0 }
  0xd6   :  { %v496_v52 = vadd.f32 %v495_v27, %v403_v46 }
  0xda   :  { %v518_v22 = vpop.f32.mrf.mxu1 }
  0xdb   :  { %v519_v54 = vadd.f32 %v518_v22, %v496_v52 }
  0xde   :  { %v541_v55 = vpop.f32.mrf.mxu2 }
  0xdf   :  { %v542_v56 = vadd.f32 %v541_v55, %v519_v54  ;;  %v851_v54 = vperm.slane %v1187_v53, 3 }
  0xe1   :  { %v564_v5 = vpop.f32.mrf.mxu3 }
  0xe2   :  { %v565_v57 = vadd.f32 %v564_v5, %v542_v56 }
  0xe4   :  { %v856_v58 = vadd.f32 %v848_v4, %v565_v57 }
  0xe6   :  { %864 = vst [vmem:[#allocation11] sm:$0xff] %v856_v58 }
  0xf1   :  { %v498_v10 = vpop.f32.mrf.mxu0 }
  0xf2   :  { %v499_v11 = vadd.f32 %v498_v10, %v406_v50 }
  0xf4   :  { %v521_v59 = vpop.f32.mrf.mxu1 }
  0xf5   :  { %v522_v60 = vadd.f32 %v521_v59, %v499_v11 }
  0xf7   :  { %v544_v61 = vpop.f32.mrf.mxu2 }
  0xf8   :  { %v545_v62 = vadd.f32 %v544_v61, %v522_v60 }
  0xfa   :  { %v567_v63 = vpop.f32.mrf.mxu3 }
  0xfb   :  { %v568_v0 = vadd.f32 %v567_v63, %v545_v62  ;;  %v587_v1 = vpop.f32.mrf.mxu0 }
  0xfc   :  { %v588_v2 = vadd.f32 %v587_v1, %v426_v47 }
  0xfd   :  { %v860_v3 = vadd.f32 %v848_v4, %v568_v0 }
  0xfe   :  { %v610_v6 = vpop.f32.mrf.mxu1 }
  0xff   :  { %868 = vst [vmem:[#allocation11 + $0x20] sm:$0xff] %v860_v3  ;;  %v611_v7 = vadd.f32 %v610_v6, %v588_v2 }
 0x101   :  { %v633_v8 = vpop.f32.mrf.mxu2 }
 0x102   :  { %v634_v9 = vadd.f32 %v633_v8, %v611_v7 }
 0x104   :  { %v656_v13 = vpop.f32.mrf.mxu3 }
 0x105   :  { %v590_v14 = vpop.f32.mrf.mxu0  ;;  %v657_v15 = vadd.f32 %v656_v13, %v634_v9 }
 0x106   :  { %v591_v17 = vadd.f32 %v590_v14, %v429_v16 }
 0x107   :  { %v857_v18 = vadd.f32 %v849_v12, %v657_v15 }
 0x108   :  { %v613_v19 = vpop.f32.mrf.mxu1 }
 0x109   :  { %865 = vst [vmem:[#allocation11 + $0x8] sm:$0xff] %v857_v18  ;;  %v614_v20 = vadd.f32 %v613_v19, %v591_v17 }
 0x10b   :  { %v636_v23 = vpop.f32.mrf.mxu2 }
 0x10c   :  { %v637_v24 = vadd.f32 %v636_v23, %v614_v20 }
 0x10e   :  { %v659_v25 = vpop.f32.mrf.mxu3 }
 0x10f   :  { %v660_v26 = vadd.f32 %v659_v25, %v637_v24 }
 0x111   :  { %v861_v28 = vadd.f32 %v849_v12, %v660_v26 }
 0x113   :  { %869 = vst [vmem:[#allocation11 + $0x28] sm:$0xff] %v861_v28 }
 0x11f   :  { %v679_v29 = vpop.f32.mrf.mxu0 }
 0x120   :  { %v680_v30 = vadd.f32 %v679_v29, %v449_v48 }
 0x122   :  { %v702_v31 = vpop.f32.mrf.mxu1 }
 0x123   :  { %v703_v32 = vadd.f32 %v702_v31, %v680_v30 }
 0x125   :  { %v725_v33 = vpop.f32.mrf.mxu2 }
 0x126   :  { %v726_v34 = vadd.f32 %v725_v33, %v703_v32 }
 0x128   :  { %v748_v36 = vpop.f32.mrf.mxu3 }
 0x129   :  { %v682_v37 = vpop.f32.mrf.mxu0  ;;  %v749_v38 = vadd.f32 %v748_v36, %v726_v34 }
 0x12a   :  { %v683_v39 = vadd.f32 %v682_v37, %v452_v21 }
 0x12b   :  { %v858_v40 = vadd.f32 %v850_v35, %v749_v38 }
 0x12c   :  { %v705_v41 = vpop.f32.mrf.mxu1 }
 0x12d   :  { %866 = vst [vmem:[#allocation11 + $0x10] sm:$0xff] %v858_v40  ;;  %v706_v42 = vadd.f32 %v705_v41, %v683_v39 }
 0x12f   :  { %v728_v43 = vpop.f32.mrf.mxu2 }
 0x130   :  { %v729_v44 = vadd.f32 %v728_v43, %v706_v42 }
 0x132   :  { %v751_v45 = vpop.f32.mrf.mxu3 }
 0x133   :  { %v752_v46 = vadd.f32 %v751_v45, %v729_v44 }
 0x135   :  { %v862_v47 = vadd.f32 %v850_v35, %v752_v46 }
 0x137   :  { %870 = vst [vmem:[#allocation11 + $0x30] sm:$0xff] %v862_v47 }
 0x143   :  { %v771_v48 = vpop.f32.mrf.mxu0 }
 0x144   :  { %v772_v50 = vadd.f32 %v771_v48, %v1179_v49 }
 0x145   :  { %v794_v16 = vpop.f32.mrf.mxu1 }
 0x146   :  { %v795_v27 = vadd.f32 %v794_v16, %v772_v50 }
 0x149   :  { %v817_v52 = vpop.f32.mrf.mxu2 }
 0x14a   :  { %v818_v22 = vadd.f32 %v817_v52, %v795_v27 }
 0x14b   :  { %v774_v21 = vpop.f32.mrf.mxu0  ;;  %v840_v55 = vpop.f32.mrf.mxu3 }
 0x14c   :  { %v775_v56 = vadd.f32 %v774_v21, %v1185_v51  ;;  %v841_v4 = vadd.f32 %v840_v55, %v818_v22 }
 0x14d   :  { %v797_v5 = vpop.f32.mrf.mxu1 }
 0x14e   :  { %v859_v57 = vadd.f32 %v851_v54, %v841_v4  ;;  %v798_v58 = vadd.f32 %v797_v5, %v775_v56 }
 0x150   :  { %867 = vst [vmem:[#allocation11 + $0x18] sm:$0xff] %v859_v57 }
 0x151   :  { %v820_v10 = vpop.f32.mrf.mxu2 }
 0x152   :  { %v821_v11 = vadd.f32 %v820_v10, %v798_v58 }
 0x153   :  { %v843_v59 = vpop.f32.mrf.mxu3 }
 0x154   :  { %v844_v49 = vadd.f32 %v843_v59, %v821_v11 }
 0x156   :  { %v863_v53 = vadd.f32 %v851_v54, %v844_v49 }
 0x158   :  { %871 = vst [vmem:[#allocation11 + $0x38] sm:$0xff] %v863_v53 }
 0x159   :  { %884 = dma.vmem_to_hbm [thread:$0]  %s877_s18, 1024, %s879_s21, [#allocation4], %s1067_s1, %s1067_s1, %s1068_s8  }
 0x15a   :  { %1061 = dma.done.wait [#allocation4], 1024  }
 0x15b   :  { %1062 = vsyncadd [#allocation4], 4294966272 }
 0x15c   :  { %889 = vsyncpa [#allocation3], 1 }
 0x15d   :  { %890 = vsyncpa [#allocation6], 1 }
 0x15e   :  { %891 = vsyncpa [#allocation9], 1 }
 0x15f   :  { %892 = vsyncpa [#allocation4], 1 }

</bundles_post_ra>
